<compile_context>
chip_gen: v6e
topology: v6e:2x2x1
jax: 0.10.0
libtpu: 0.0.40
codegen_flags: <defaults>
</compile_context>

<pallas_src>
import functools

import jax
import jax.numpy as jnp
from jax import lax
from jax.experimental import pallas as pl
from jax.experimental.pallas import tpu as pltpu


def pre_extraction_kernel(x_ref, w1_ref, b1_ref, w2_ref, b2_ref,
                          w3_ref, b3_ref, out_ref, *,
                          neighbors, chunk_groups, num_chunks):
    """One grid step: TG groups of `neighbors` points.

    x_ref : (TG*N, D) input dtype (f32 here) — cast to bf16 in-kernel.
    wK    : (Cin, Cp) bf16 folded conv+BN weights (VMEM-resident).
    bK    : (1, Cp)   f32 folded bias.
    out   : (TG, Cp)  f32 per-group max-pooled features (Cp = C padded to 128).
    """
    n = neighbors
    cg = chunk_groups
    crows = cg * n
    cp = out_ref.shape[1]

    # One read per constant operand; resident across all chunks of this step.
    w1 = w1_ref[...]
    w2 = w2_ref[...]
    w3 = w3_ref[...]
    b1 = b1_ref[...]
    b2 = b2_ref[...]
    b3 = b3_ref[...]

    def chain(x_rows):
        # transfer: Conv1d(d -> C, ks=1) + BN + ReLU  (bf16 MXU, f32 accumulate).
        # D may be lane-unaligned (e.g. 11); Mosaic masks the padded region.
        xb = x_rows.astype(jnp.bfloat16)
        h1 = jnp.maximum(
            jnp.dot(xb, w1, preferred_element_type=jnp.float32) + b1, 0.0)
        # ConvBNReLURes1D.net1: Conv1d(C -> C) + BN + ReLU
        h2 = jnp.maximum(
            jnp.dot(h1.astype(jnp.bfloat16), w2,
                    preferred_element_type=jnp.float32) + b2, 0.0)
        # ConvBNReLURes1D.net2: Conv1d(C -> C) + BN, residual (f32 h1) + ReLU
        h3 = jnp.dot(h2.astype(jnp.bfloat16), w3,
                     preferred_element_type=jnp.float32) + b3
        y = jnp.maximum(h3 + h1, 0.0)
        # adaptive_max_pool1d(., 1): per-group max over the N point axis (XLU).
        return jnp.max(y.reshape(-1, n, cp), axis=1)

    if num_chunks == 1:
        out_ref[...] = chain(x_ref[...])
    else:
        # Group-aligned chunk loop: bounds the live f32 intermediates (h1 must
        # survive two matmuls for the residual) to one chunk, while the outer
        # BlockSpec tile stays large for DMA efficiency.
        def chunk_body(c, carry):
            r0 = pl.multiple_of(c * crows, crows)
            g0 = pl.multiple_of(c * cg, cg)
            out_ref[pl.ds(g0, cg), :] = chain(x_ref[pl.ds(r0, crows), :])
            return carry

        lax.fori_loop(0, num_chunks, chunk_body, 0)


def _round_up(v, m):
    return ((v + m - 1) // m) * m


def _pick_chunk_groups(tg, n, chunk_rows):
    cg = max(1, min(tg, chunk_rows // max(n, 1)))
    while tg % cg:
        cg -= 1
    return cg


def _vmem_estimate(tg, n, d, cp, cg, x_itemsize):
    rows, crows = tg * n, cg * n
    return (2 * rows * d * x_itemsize            # double-buffered input tile
            + 2 * tg * cp * 4                    # double-buffered output tile
            + (d * cp + 2 * cp * cp) * 2         # resident bf16 weights
            + 3 * cp * 4                         # resident f32 biases
            + crows * cp * 16)                   # live per-chunk intermediates


def pre_extraction_forward(x_gnd, w1, b1, w2, b2, w3, b3, *,
                           target_rows=2048, chunk_rows=1024,
                           vmem_budget=40 * 1024 * 1024):
    """PreExtraction forward (inference, BN folded).

    x_gnd: (G, N, D) float — G = batch*sample groups, N neighbors, D channels.
    wK:    (Cout, Cin) folded conv+BN weight; bK: (Cout,) folded bias.
    Returns (G, C) float32 per-group pooled features.
    """
    G, N, D = x_gnd.shape
    C = w1.shape[0]
    Cp = _round_up(C, 128)                 # lane-dense stores / full MXU lanes
    x_itemsize = jnp.dtype(x_gnd.dtype).itemsize

    # --- groups per grid step: target ~target_rows flattened rows per step,
    # keep >= 2 grid steps when possible, output rows multiple of 8. ---
    tg = max(1, target_rows // max(N, 1))
    if G >= 16:
        tg = min(tg, G // 2)               # at least two grid steps
    tg = min(tg, max(G, 1))
    tg = max(8, (tg // 8) * 8)             # sublane-aligned blocks
    # Shrink until the per-step working set fits a conservative VMEM budget
    # (sized for v7x's 64 MiB; v5e/v6e have far more headroom).
    while tg > 8 and _vmem_estimate(
            tg, N, D, Cp, _pick_chunk_groups(tg, N, chunk_rows),
            x_itemsize) > vmem_budget:
        tg -= 8
    # Prefer an even grid so v7x's two TensorCores split the parallel axis.
    if (-(-G // tg)) % 2 == 1 and (-(-G // tg)) > 1:
        for cand in range(tg, 7, -8):
            if (-(-G // cand)) % 2 == 0:
                tg = cand
                break

    cg = _pick_chunk_groups(tg, N, chunk_rows)
    num_chunks = tg // cg
    nblocks = -(-G // tg)
    Gp = nblocks * tg

    # x stays in its native dtype: no host-side pad/cast pre-pass (saves a full
    # HBM read+write of x). Only a group-count remainder (if any) is padded;
    # padded groups get their own (discarded) output rows.
    if Gp != G:
        x_use = jnp.concatenate(
            [x_gnd, jnp.zeros((Gp - G, N, D), x_gnd.dtype)], axis=0)
    else:
        x_use = x_gnd
    x_flat = x_use.reshape(Gp * N, D)

    # bf16 weights / f32 biases; output channels zero-padded to Cp so the
    # padded channels stay exactly zero through relu/residual and are sliced.
    w1p = jnp.zeros((D, Cp), jnp.bfloat16).at[:, :C].set(w1.T.astype(jnp.bfloat16))
    w2p = jnp.zeros((Cp, Cp), jnp.bfloat16).at[:C, :C].set(w2.T.astype(jnp.bfloat16))
    w3p = jnp.zeros((Cp, Cp), jnp.bfloat16).at[:C, :C].set(w3.T.astype(jnp.bfloat16))
    b1p = jnp.zeros((1, Cp), jnp.float32).at[0, :C].set(b1.astype(jnp.float32))
    b2p = jnp.zeros((1, Cp), jnp.float32).at[0, :C].set(b2.astype(jnp.float32))
    b3p = jnp.zeros((1, Cp), jnp.float32).at[0, :C].set(b3.astype(jnp.float32))

    kernel = functools.partial(pre_extraction_kernel, neighbors=N,
                               chunk_groups=cg, num_chunks=num_chunks)
    vmem_limit = int(min(64 * 1024 * 1024,
                         max(32 * 1024 * 1024,
                             2 * _vmem_estimate(tg, N, D, Cp, cg, x_itemsize))))

    def run(weight_pipeline_mode):
        kw = ({} if weight_pipeline_mode is None
              else {"pipeline_mode": weight_pipeline_mode})

        def const_spec(shape):
            return pl.BlockSpec(shape, lambda g: (0, 0), **kw)

        return pl.pallas_call(
            kernel,
            out_shape=jax.ShapeDtypeStruct((Gp, Cp), jnp.float32),
            grid_spec=pltpu.PrefetchScalarGridSpec(
                num_scalar_prefetch=0,
                grid=(nblocks,),
                in_specs=[
                    pl.BlockSpec((tg * N, D), lambda g: (g, 0)),
                    const_spec((D, Cp)), const_spec((1, Cp)),
                    const_spec((Cp, Cp)), const_spec((1, Cp)),
                    const_spec((Cp, Cp)), const_spec((1, Cp)),
                ],
                out_specs=pl.BlockSpec((tg, Cp), lambda g: (g, 0)),
            ),
            compiler_params=pltpu.CompilerParams(
                dimension_semantics=("parallel",),
                vmem_limit_bytes=vmem_limit),
        )(x_flat, w1p, b1p, w2p, b2p, w3p, b3p)

    try:
        # Constant-index weights don't need double buffers; single buffering
        # frees VMEM headroom (matters most under v7x's 64 MiB).
        out = run(pl.Buffered(1))
    except Exception:
        out = run(None)   # fall back to default buffering if unsupported

    return out[:G, :C]


def fold_bn(w, b, gamma, beta, mean, var, eps=1e-5):
    """Fold inference-mode BatchNorm1d into a 1x1 Conv1d. w: (Cout, Cin), b: (Cout,)."""
    scale = gamma / jnp.sqrt(var + eps)
    return w * scale[:, None], (b - mean) * scale + beta


def init_conv_bn(kw, kb, kbn, cin, cout):
    w = 0.1 * jax.random.normal(kw, (cout, cin), jnp.float32)
    bias = 0.1 * jax.random.normal(kb, (cout,), jnp.float32)
    kg, kbt, km, kv = jax.random.split(kbn, 4)
    gamma = 1.0 + 0.1 * jax.random.normal(kg, (cout,), jnp.float32)
    beta = 0.1 * jax.random.normal(kbt, (cout,), jnp.float32)
    mean = 0.1 * jax.random.normal(km, (cout,), jnp.float32)
    var = jnp.abs(jax.random.normal(kv, (cout,), jnp.float32)) + 0.5
    return fold_bn(w, bias, gamma, beta, mean, var)


if __name__ == "__main__":
    key = jax.random.PRNGKey(0)
    keys = jax.random.split(key, 10)

    # Small shapes implied by the module: x is [batch, sample, neighbor, 2*dim+3]
    b, s, n = 2, 16, 16
    in_channels, out_channels = 4, 32
    d = 2 * in_channels + 3          # use_xyz=True -> 11
    C = out_channels

    x = jax.random.normal(keys[0], (b, s, n, d), jnp.float32)

    # transfer (d -> C), net1 (C -> C), net2 (C -> C); BN folded in.
    w1, b1 = init_conv_bn(keys[1], keys[2], keys[3], d, C)
    w2, b2 = init_conv_bn(keys[4], keys[5], keys[6], C, C)
    w3, b3 = init_conv_bn(keys[7], keys[8], keys[9], C, C)

    # PyTorch: x.permute(0,1,3,2).reshape(-1, d, n) == NCL per group; the
    # channels-last group tensor used here is just x.reshape(b*s, n, d).
    x_gnd = x.reshape(b * s, n, d)

    # chunk_rows=128 exercises the inner group-chunk loop at demo scale
    # (production sizes use the 1024-row default).
    out = pre_extraction_forward(x_gnd, w1, b1, w2, b2, w3, b3,
                                 chunk_rows=128)                   # (G, C)
    out = jax.block_until_ready(out)

    # view(b*s, -1) -> reshape(b, s, -1) -> permute(0, 2, 1) => [b, C, s]
    y = out.reshape(b, s, C).transpose(0, 2, 1)

    # Pure-JAX reference with the same bf16-input / f32-accumulate precision.
    f32 = jnp.float32
    hp = jax.lax.Precision.HIGHEST
    xbf = x_gnd.astype(jnp.bfloat16).astype(f32)
    w1b = w1.astype(jnp.bfloat16).astype(f32)
    w2b = w2.astype(jnp.bfloat16).astype(f32)
    w3b = w3.astype(jnp.bfloat16).astype(f32)
    h1 = jnp.maximum(jnp.einsum("gnd,cd->gnc", xbf, w1b, precision=hp) + b1, 0.0)
    h2 = jnp.maximum(
        jnp.einsum("gnc,kc->gnk", h1.astype(jnp.bfloat16).astype(f32), w2b,
                   precision=hp) + b2, 0.0)
    h3 = jnp.einsum("gnc,kc->gnk", h2.astype(jnp.bfloat16).astype(f32), w3b,
                    precision=hp) + b3
    y_full = jnp.maximum(h3 + h1, 0.0)
    y_ref = jnp.max(y_full, axis=1).reshape(b, s, C).transpose(0, 2, 1)

    assert y.shape == (b, C, s)
    assert jnp.allclose(y, y_ref, rtol=1e-4, atol=1e-4), \
        float(jnp.max(jnp.abs(y - y_ref)))

    print("KERNEL_OK")
</pallas_src>

<mosaic_0001>
module attributes {stable_mosaic.version = 11 : i64} {
  func.func @pre_extraction_kernel(%arg0: i32, %arg1: memref<256x11xf32, #tpu.memory_space<vmem>>, %arg2: memref<11x128xbf16, #tpu.memory_space<vmem>>, %arg3: memref<1x128xf32, #tpu.memory_space<vmem>>, %arg4: memref<128x128xbf16, #tpu.memory_space<vmem>>, %arg5: memref<1x128xf32, #tpu.memory_space<vmem>>, %arg6: memref<128x128xbf16, #tpu.memory_space<vmem>>, %arg7: memref<1x128xf32, #tpu.memory_space<vmem>>, %arg8: memref<16x128xf32, #tpu.memory_space<vmem>>) attributes {dimension_semantics = [#tpu.dimension_semantics<parallel>], iteration_bounds = array<i64: 2>, scalar_prefetch = 0 : i64, scratch_operands = 0 : i64, tpu.core_type = #tpu.core_type<tc>, window_params = [{transform_indices = @transform_0, window_bounds = array<i64: 256, 11>}, {pipeline_mode = #tpu.pipeline_mode<synchronous>, transform_indices = @transform_1, window_bounds = array<i64: 11, 128>}, {pipeline_mode = #tpu.pipeline_mode<synchronous>, transform_indices = @transform_2, window_bounds = array<i64: 1, 128>}, {pipeline_mode = #tpu.pipeline_mode<synchronous>, transform_indices = @transform_3, window_bounds = array<i64: 128, 128>}, {pipeline_mode = #tpu.pipeline_mode<synchronous>, transform_indices = @transform_4, window_bounds = array<i64: 1, 128>}, {pipeline_mode = #tpu.pipeline_mode<synchronous>, transform_indices = @transform_5, window_bounds = array<i64: 128, 128>}, {pipeline_mode = #tpu.pipeline_mode<synchronous>, transform_indices = @transform_6, window_bounds = array<i64: 1, 128>}, {transform_indices = @transform_7, window_bounds = array<i64: 16, 128>}]} {
    %c0 = arith.constant 0 : index
    %c0_0 = arith.constant 0 : index
    %0 = vector.load %arg2[%c0, %c0_0] : memref<11x128xbf16, #tpu.memory_space<vmem>>, vector<11x128xbf16>
    %c0_1 = arith.constant 0 : index
    %c0_2 = arith.constant 0 : index
    %1 = vector.load %arg4[%c0_1, %c0_2] : memref<128x128xbf16, #tpu.memory_space<vmem>>, vector<128x128xbf16>
    %c0_3 = arith.constant 0 : index
    %c0_4 = arith.constant 0 : index
    %2 = vector.load %arg6[%c0_3, %c0_4] : memref<128x128xbf16, #tpu.memory_space<vmem>>, vector<128x128xbf16>
    %c0_5 = arith.constant 0 : index
    %c0_6 = arith.constant 0 : index
    %3 = vector.load %arg3[%c0_5, %c0_6] : memref<1x128xf32, #tpu.memory_space<vmem>>, vector<1x128xf32>
    %c0_7 = arith.constant 0 : index
    %c0_8 = arith.constant 0 : index
    %4 = vector.load %arg5[%c0_7, %c0_8] : memref<1x128xf32, #tpu.memory_space<vmem>>, vector<1x128xf32>
    %c0_9 = arith.constant 0 : index
    %c0_10 = arith.constant 0 : index
    %5 = vector.load %arg7[%c0_9, %c0_10] : memref<1x128xf32, #tpu.memory_space<vmem>>, vector<1x128xf32>
    %c0_i32 = arith.constant 0 : i32
    %c2_i32 = arith.constant 2 : i32
    %6 = arith.addi %c0_i32, %c2_i32 : i32
    %c1_i32 = arith.constant 1 : i32
    scf.for %arg9 = %c0_i32 to %6 step %c1_i32  : i32 {
      %c128_i32 = arith.constant 128 : i32
      %7 = arith.muli %arg9, %c128_i32 : i32
      %8 = tpu.assume_multiple %7, 128 : i32
      %c8_i32 = arith.constant 8 : i32
      %9 = arith.muli %arg9, %c8_i32 : i32
      %10 = tpu.assume_multiple %9, 8 : i32
      %11 = arith.index_cast %8 : i32 to index
      %c0_12 = arith.constant 0 : index
      %12 = vector.load %arg1[%11, %c0_12] : memref<256x11xf32, #tpu.memory_space<vmem>>, vector<128x11xf32>
      %13 = arith.truncf %12 : vector<128x11xf32> to vector<128x11xbf16>
      %cst = arith.constant dense<0.000000e+00> : vector<128x128xf32>
      %14 = tpu.matmul %13, %0, %cst {dimension_numbers = #tpu.dot_dimension_numbers<[1], [0], [0], [1], [0, 0, 1, 1], [], []>} : vector<128x11xbf16>, vector<11x128xbf16>, vector<128x128xf32> -> vector<128x128xf32>
      %15 = vector.broadcast %3 : vector<1x128xf32> to vector<128x128xf32>
      %16 = arith.addf %14, %15 : vector<128x128xf32>
      %cst_13 = arith.constant 0.000000e+00 : f32
      %17 = vector.broadcast %cst_13 : f32 to vector<128x128xf32>
      %18 = arith.maximumf %16, %17 : vector<128x128xf32>
      %19 = arith.truncf %18 : vector<128x128xf32> to vector<128x128xbf16>
      %cst_14 = arith.constant dense<0.000000e+00> : vector<128x128xf32>
      %20 = tpu.matmul %19, %1, %cst_14 {dimension_numbers = #tpu.dot_dimension_numbers<[1], [0], [0], [1], [0, 0, 1, 1], [], []>} : vector<128x128xbf16>, vector<128x128xbf16>, vector<128x128xf32> -> vector<128x128xf32>
      %21 = vector.broadcast %4 : vector<1x128xf32> to vector<128x128xf32>
      %22 = arith.addf %20, %21 : vector<128x128xf32>
      %cst_15 = arith.constant 0.000000e+00 : f32
      %23 = vector.broadcast %cst_15 : f32 to vector<128x128xf32>
      %24 = arith.maximumf %22, %23 : vector<128x128xf32>
      %25 = arith.truncf %24 : vector<128x128xf32> to vector<128x128xbf16>
      %cst_16 = arith.constant dense<0.000000e+00> : vector<128x128xf32>
      %26 = tpu.matmul %25, %2, %cst_16 {dimension_numbers = #tpu.dot_dimension_numbers<[1], [0], [0], [1], [0, 0, 1, 1], [], []>} : vector<128x128xbf16>, vector<128x128xbf16>, vector<128x128xf32> -> vector<128x128xf32>
      %27 = vector.broadcast %5 : vector<1x128xf32> to vector<128x128xf32>
      %28 = arith.addf %26, %27 : vector<128x128xf32>
      %29 = arith.addf %28, %18 : vector<128x128xf32>
      %cst_17 = arith.constant 0.000000e+00 : f32
      %30 = vector.broadcast %cst_17 : f32 to vector<128x128xf32>
      %31 = arith.maximumf %29, %30 : vector<128x128xf32>
      %32 = vector.shape_cast %31 : vector<128x128xf32> to vector<8x16x128xf32>
      %cst_18 = arith.constant dense<0xFF800000> : vector<8x128xf32>
      %33 = vector.multi_reduction <maximumf>, %32, %cst_18 [1] : vector<8x16x128xf32> to vector<8x128xf32>
      %34 = arith.index_cast %10 : i32 to index
      %c0_19 = arith.constant 0 : index
      %35 = vector.load %arg8[%34, %c0_19] : memref<16x128xf32, #tpu.memory_space<vmem>>, vector<8x128xf32>
      tpu.vector_store %arg8[%34, %c0_19], %33 {strides = array<i32>} : memref<16x128xf32, #tpu.memory_space<vmem>>, vector<8x128xf32>,
    }
    %c2_i32_11 = arith.constant 2 : i32
    return
  }
  func.func @transform_0(%arg0: i32) -> (i32, i32) {
    %c0_i32 = arith.constant 0 : i32
    %c0_i32_0 = arith.constant 0 : i32
    return %arg0, %c0_i32 : i32, i32
  }
  func.func @transform_1(%arg0: i32) -> (i32, i32) {
    %c0_i32 = arith.constant 0 : i32
    %c0_i32_0 = arith.constant 0 : i32
    %c0_i32_1 = arith.constant 0 : i32
    return %c0_i32, %c0_i32_0 : i32, i32
  }
  func.func @transform_2(%arg0: i32) -> (i32, i32) {
    %c0_i32 = arith.constant 0 : i32
    %c0_i32_0 = arith.constant 0 : i32
    %c0_i32_1 = arith.constant 0 : i32
    return %c0_i32, %c0_i32_0 : i32, i32
  }
  func.func @transform_3(%arg0: i32) -> (i32, i32) {
    %c0_i32 = arith.constant 0 : i32
    %c0_i32_0 = arith.constant 0 : i32
    %c0_i32_1 = arith.constant 0 : i32
    return %c0_i32, %c0_i32_0 : i32, i32
  }
  func.func @transform_4(%arg0: i32) -> (i32, i32) {
    %c0_i32 = arith.constant 0 : i32
    %c0_i32_0 = arith.constant 0 : i32
    %c0_i32_1 = arith.constant 0 : i32
    return %c0_i32, %c0_i32_0 : i32, i32
  }
  func.func @transform_5(%arg0: i32) -> (i32, i32) {
    %c0_i32 = arith.constant 0 : i32
    %c0_i32_0 = arith.constant 0 : i32
    %c0_i32_1 = arith.constant 0 : i32
    return %c0_i32, %c0_i32_0 : i32, i32
  }
  func.func @transform_6(%arg0: i32) -> (i32, i32) {
    %c0_i32 = arith.constant 0 : i32
    %c0_i32_0 = arith.constant 0 : i32
    %c0_i32_1 = arith.constant 0 : i32
    return %c0_i32, %c0_i32_0 : i32, i32
  }
  func.func @transform_7(%arg0: i32) -> (i32, i32) {
    %c0_i32 = arith.constant 0 : i32
    %c0_i32_0 = arith.constant 0 : i32
    return %arg0, %c0_i32 : i32, i32
  }
}

module attributes {stable_mosaic.version = 11 : i64} {
  func.func @pre_extraction_kernel(%arg0: i32, %arg1: memref<256x11xf32, #tpu.memory_space<vmem>>, %arg2: memref<11x128xbf16, #tpu.memory_space<vmem>>, %arg3: memref<1x128xf32, #tpu.memory_space<vmem>>, %arg4: memref<128x128xbf16, #tpu.memory_space<vmem>>, %arg5: memref<1x128xf32, #tpu.memory_space<vmem>>, %arg6: memref<128x128xbf16, #tpu.memory_space<vmem>>, %arg7: memref<1x128xf32, #tpu.memory_space<vmem>>, %arg8: memref<16x128xf32, #tpu.memory_space<vmem>>) attributes {dimension_semantics = [#tpu.dimension_semantics<parallel>], iteration_bounds = array<i64: 2>, scalar_prefetch = 0 : i64, scratch_operands = 0 : i64, tpu.core_type = #tpu.core_type<tc>, window_params = [{transform_indices = @transform_0, window_bounds = array<i64: 256, 11>}, {pipeline_mode = #tpu.pipeline_mode<synchronous>, transform_indices = @transform_1, window_bounds = array<i64: 11, 128>}, {pipeline_mode = #tpu.pipeline_mode<synchronous>, transform_indices = @transform_2, window_bounds = array<i64: 1, 128>}, {pipeline_mode = #tpu.pipeline_mode<synchronous>, transform_indices = @transform_3, window_bounds = array<i64: 128, 128>}, {pipeline_mode = #tpu.pipeline_mode<synchronous>, transform_indices = @transform_4, window_bounds = array<i64: 1, 128>}, {pipeline_mode = #tpu.pipeline_mode<synchronous>, transform_indices = @transform_5, window_bounds = array<i64: 128, 128>}, {pipeline_mode = #tpu.pipeline_mode<synchronous>, transform_indices = @transform_6, window_bounds = array<i64: 1, 128>}, {transform_indices = @transform_7, window_bounds = array<i64: 16, 128>}]} {
    %c0 = arith.constant 0 : index
    %c0_0 = arith.constant 0 : index
    %0 = vector.load %arg2[%c0, %c0_0] : memref<11x128xbf16, #tpu.memory_space<vmem>>, vector<11x128xbf16>
    %c0_1 = arith.constant 0 : index
    %c0_2 = arith.constant 0 : index
    %1 = vector.load %arg4[%c0_1, %c0_2] : memref<128x128xbf16, #tpu.memory_space<vmem>>, vector<128x128xbf16>
    %c0_3 = arith.constant 0 : index
    %c0_4 = arith.constant 0 : index
    %2 = vector.load %arg6[%c0_3, %c0_4] : memref<128x128xbf16, #tpu.memory_space<vmem>>, vector<128x128xbf16>
    %c0_5 = arith.constant 0 : index
    %c0_6 = arith.constant 0 : index
    %3 = vector.load %arg3[%c0_5, %c0_6] : memref<1x128xf32, #tpu.memory_space<vmem>>, vector<1x128xf32>
    %c0_7 = arith.constant 0 : index
    %c0_8 = arith.constant 0 : index
    %4 = vector.load %arg5[%c0_7, %c0_8] : memref<1x128xf32, #tpu.memory_space<vmem>>, vector<1x128xf32>
    %c0_9 = arith.constant 0 : index
    %c0_10 = arith.constant 0 : index
    %5 = vector.load %arg7[%c0_9, %c0_10] : memref<1x128xf32, #tpu.memory_space<vmem>>, vector<1x128xf32>
    %c0_i32 = arith.constant 0 : i32
    %c2_i32 = arith.constant 2 : i32
    %6 = arith.addi %c0_i32, %c2_i32 : i32
    %c1_i32 = arith.constant 1 : i32
    scf.for %arg9 = %c0_i32 to %6 step %c1_i32  : i32 {
      %c128_i32 = arith.constant 128 : i32
      %7 = arith.muli %arg9, %c128_i32 : i32
      %8 = tpu.assume_multiple %7, 128 : i32
      %c8_i32 = arith.constant 8 : i32
      %9 = arith.muli %arg9, %c8_i32 : i32
      %10 = tpu.assume_multiple %9, 8 : i32
      %11 = arith.index_cast %8 : i32 to index
      %c0_12 = arith.constant 0 : index
      %12 = vector.load %arg1[%11, %c0_12] : memref<256x11xf32, #tpu.memory_space<vmem>>, vector<128x11xf32>
      %13 = arith.truncf %12 : vector<128x11xf32> to vector<128x11xbf16>
      %cst = arith.constant dense<0.000000e+00> : vector<128x128xf32>
      %14 = tpu.matmul %13, %0, %cst {dimension_numbers = #tpu.dot_dimension_numbers<[1], [0], [0], [1], [0, 0, 1, 1], [], []>} : vector<128x11xbf16>, vector<11x128xbf16>, vector<128x128xf32> -> vector<128x128xf32>
      %15 = vector.broadcast %3 : vector<1x128xf32> to vector<128x128xf32>
      %16 = arith.addf %14, %15 : vector<128x128xf32>
      %cst_13 = arith.constant 0.000000e+00 : f32
      %17 = vector.broadcast %cst_13 : f32 to vector<128x128xf32>
      %18 = arith.maximumf %16, %17 : vector<128x128xf32>
      %19 = arith.truncf %18 : vector<128x128xf32> to vector<128x128xbf16>
      %cst_14 = arith.constant dense<0.000000e+00> : vector<128x128xf32>
      %20 = tpu.matmul %19, %1, %cst_14 {dimension_numbers = #tpu.dot_dimension_numbers<[1], [0], [0], [1], [0, 0, 1, 1], [], []>} : vector<128x128xbf16>, vector<128x128xbf16>, vector<128x128xf32> -> vector<128x128xf32>
      %21 = vector.broadcast %4 : vector<1x128xf32> to vector<128x128xf32>
      %22 = arith.addf %20, %21 : vector<128x128xf32>
      %cst_15 = arith.constant 0.000000e+00 : f32
      %23 = vector.broadcast %cst_15 : f32 to vector<128x128xf32>
      %24 = arith.maximumf %22, %23 : vector<128x128xf32>
      %25 = arith.truncf %24 : vector<128x128xf32> to vector<128x128xbf16>
      %cst_16 = arith.constant dense<0.000000e+00> : vector<128x128xf32>
      %26 = tpu.matmul %25, %2, %cst_16 {dimension_numbers = #tpu.dot_dimension_numbers<[1], [0], [0], [1], [0, 0, 1, 1], [], []>} : vector<128x128xbf16>, vector<128x128xbf16>, vector<128x128xf32> -> vector<128x128xf32>
      %27 = vector.broadcast %5 : vector<1x128xf32> to vector<128x128xf32>
      %28 = arith.addf %26, %27 : vector<128x128xf32>
      %29 = arith.addf %28, %18 : vector<128x128xf32>
      %cst_17 = arith.constant 0.000000e+00 : f32
      %30 = vector.broadcast %cst_17 : f32 to vector<128x128xf32>
      %31 = arith.maximumf %29, %30 : vector<128x128xf32>
      %32 = vector.shape_cast %31 : vector<128x128xf32> to vector<8x16x128xf32>
      %cst_18 = arith.constant dense<0xFF800000> : vector<8x128xf32>
      %33 = vector.multi_reduction <maximumf>, %32, %cst_18 [1] : vector<8x16x128xf32> to vector<8x128xf32>
      %34 = arith.index_cast %10 : i32 to index
      %c0_19 = arith.constant 0 : index
      %35 = vector.load %arg8[%34, %c0_19] : memref<16x128xf32, #tpu.memory_space<vmem>>, vector<8x128xf32>
      tpu.vector_store %arg8[%34, %c0_19], %33 {strides = array<i32>} : memref<16x128xf32, #tpu.memory_space<vmem>>, vector<8x128xf32>,
    }
    %c2_i32_11 = arith.constant 2 : i32
    return
  }
  func.func @transform_0(%arg0: i32) -> (i32, i32) {
    %c0_i32 = arith.constant 0 : i32
    %c0_i32_0 = arith.constant 0 : i32
    return %arg0, %c0_i32 : i32, i32
  }
  func.func @transform_1(%arg0: i32) -> (i32, i32) {
    %c0_i32 = arith.constant 0 : i32
    %c0_i32_0 = arith.constant 0 : i32
    %c0_i32_1 = arith.constant 0 : i32
    return %c0_i32, %c0_i32_0 : i32, i32
  }
  func.func @transform_2(%arg0: i32) -> (i32, i32) {
    %c0_i32 = arith.constant 0 : i32
    %c0_i32_0 = arith.constant 0 : i32
    %c0_i32_1 = arith.constant 0 : i32
    return %c0_i32, %c0_i32_0 : i32, i32
  }
  func.func @transform_3(%arg0: i32) -> (i32, i32) {
    %c0_i32 = arith.constant 0 : i32
    %c0_i32_0 = arith.constant 0 : i32
    %c0_i32_1 = arith.constant 0 : i32
    return %c0_i32, %c0_i32_0 : i32, i32
  }
  func.func @transform_4(%arg0: i32) -> (i32, i32) {
    %c0_i32 = arith.constant 0 : i32
    %c0_i32_0 = arith.constant 0 : i32
    %c0_i32_1 = arith.constant 0 : i32
    return %c0_i32, %c0_i32_0 : i32, i32
  }
  func.func @transform_5(%arg0: i32) -> (i32, i32) {
    %c0_i32 = arith.constant 0 : i32
    %c0_i32_0 = arith.constant 0 : i32
    %c0_i32_1 = arith.constant 0 : i32
    return %c0_i32, %c0_i32_0 : i32, i32
  }
  func.func @transform_6(%arg0: i32) -> (i32, i32) {
    %c0_i32 = arith.constant 0 : i32
    %c0_i32_0 = arith.constant 0 : i32
    %c0_i32_1 = arith.constant 0 : i32
    return %c0_i32, %c0_i32_0 : i32, i32
  }
  func.func @transform_7(%arg0: i32) -> (i32, i32) {
    %c0_i32 = arith.constant 0 : i32
    %c0_i32_0 = arith.constant 0 : i32
    return %arg0, %c0_i32 : i32, i32
  }
}

</mosaic_0001>

<bundles_post_ra>
// kernel: tpu_custom_call.1
= control target key start
LH: loop header
LB: loop body
LE: loop exit
PB: predicated region body
PF: predicated region fallthrough
CT: control target
= control target key end

     0   :  { %12 = vsyncpa [#allocation3], 0  ;;  %s1899_s0 = inlined_call_operand.vmem [shape: f32[512,11], index: 0, kind: input, shape index: {}]   ;;  %s1900_s1 = inlined_call_operand.vmem [shape: bf16[11,128], index: 1, kind: input, shape index: {}]   ;;  %s1901_s2 = inlined_call_operand.vmem [shape: f32[1,128], index: 2, kind: input, shape index: {}]   ;;  %s1902_s3 = inlined_call_operand.vmem [shape: bf16[128,128], index: 3, kind: input, shape index: {}]   ;;  %s1903_s4 = inlined_call_operand.vmem [shape: f32[1,128], index: 4, kind: input, shape index: {}]   ;;  %s1904_s5 = inlined_call_operand.vmem [shape: bf16[128,128], index: 5, kind: input, shape index: {}]   ;;  %s1905_s6 = inlined_call_operand.vmem [shape: f32[1,128], index: 6, kind: input, shape index: {}]   ;;  %s1906_s7 = inlined_call_operand.hbm [shape: f32[32,128], index: 7, kind: output, shape index: {}]  }
   0x1   :  { %14 = vsyncpa [#allocation3 + $0x1], 0  ;;  %s1369_s24 = smov 0   ;;  %s1371_s25 = smov 0  }
   0x2   :  { %s1373_s26 = smov 0   ;;  %s1375_s27 = smov 0  }
   0x3 LB: > { %s1390_s28 = sadd.s32 4294967295, %s1319_s27   ;;  %s1039_s29 = sadd.s32 4294967294, %s1319_s27   ;;  %s1319_s27 = sphi %s1375_s27, %s1962_s27   ;;  %s1315_s26 = sphi %s1373_s26, %s1961_s26   ;;  %s1311_s25 = sphi %s1371_s25, %s1960_s25   ;;  %s1307_s24 = sphi %s1369_s24, %s1959_s24  }
   0x4   : > { %s1394_s30 = sadd.s32 1, %s1319_s27   ;;  %s179_s8 = sadd.s32 1, %s1315_s26 }
   0x5   : > { %s176_s9 = ssub.s32 %s1319_s27, %s1394_s30  ;;  %p189_p0 = scmp.ne.s32.totalorder %s1315_s26, %s1311_s25 }
   0x6   : > { %p177_p1 = scmp.eq.s32.totalorder %s176_s9, 0  ;;  %p190_p2 = scmp.eq.s32.totalorder %s1390_s28, 1 }
   0x7   : > { %p195_p3 = scmp.ne.s32.totalorder %s1311_s25, %s1307_s24  ;;  %p196_p4 = scmp.eq.s32.totalorder %s1039_s29, 1 }
   0x8   : > { %s1405_s10 = scalar_select %p177_p1, %s1315_s26, %s179_s8  }
   0x9   : > { %p1407_p5 = por %p190_p2, %p189_p0  ;;  %p1411_p6 = por %p196_p4, %p195_p3 }
   0xa   : > { %p1042_p7 = scmp.ge.s32.totalorder %s1319_s27, 1  ;;  %p241_p8 = scmp.lt.s32.totalorder %s1319_s27, 3 }
   0xc   : > { %p242_p9 = pnand %p1042_p7, %p241_p8 }
   0xe   : > { %245 = sbr.rel (%p242_p9) target bundleno = 716 (0x2cc), region = 48 }
  0x13   : > { %s270_s13 = sand.u32 1, %s1311_s25   ;;  %s1044_s14 = sshll.u32 %s1390_s28, 5  ;;  %v1422_v0 = vld [vmem:[%s1900_s1] sm:$0xf]  ;;  %v1427_v1 = vld [vmem:[%s1900_s1 + $0x4] sm:$0x3] }
  0x14   : > { %1925 = vst [vmem:[#allocation5_spill] sm:$0xff] %v1422_v0  ;;  %1926 = vst [vmem:[#allocation6_spill] sm:$0xff] %v1427_v1  ;;  %s1431_s19 = sshll.u32 %s270_s13, 4  ;;  %p274_p10 = scmp.lt.s32.totalorder %s1044_s14, 63  ;;  %v1436_v2 = vld [vmem:[%s1902_s3] sm:$0xf] }
  0x15   : > { %1927 = vst [vmem:[#allocation7_spill] sm:$0xff] %v1436_v2  ;;  %v1441_v3 = vld [vmem:[%s1902_s3 + $0x4] sm:$0xf]  ;;  %v1446_v4 = vld [vmem:[%s1902_s3 + $0x8] sm:$0xf]  ;;  %s272_s16 = scalar_lea.vmem [#allocation2], %s1431_s19 }
  0x16   : > { %1928 = vst [vmem:[#allocation8_spill] sm:$0xff] %v1441_v3  ;;  %1929 = vst [vmem:[#allocation9_spill] sm:$0xff] %v1446_v4  ;;  %v1451_v5 = vld [vmem:[%s1902_s3 + $0xc] sm:$0xf]  ;;  %s1964_s14 = smov (!%p274_p10, %s1044_s14), 63  ;;  %s1614_s17 = smov 0  }
  0x17   : > { %1930 = vst [vmem:[#allocation10_spill] sm:$0xff] %v1451_v5  ;;  %v1456_v6 = vld [vmem:[%s1902_s3 + $0x10] sm:$0xf]  ;;  %v1461_v7 = vld [vmem:[%s1902_s3 + $0x14] sm:$0xf]  ;;  %s1045_s15 = sshll.u32 %s1964_s14, 3 }
  0x18   : > { %1931 = vst [vmem:[#allocation11_spill] sm:$0xff] %v1456_v6  ;;  %1932 = vst [vmem:[#allocation12_spill] sm:$0xff] %v1461_v7  ;;  %v1466_v8 = vld [vmem:[%s1902_s3 + $0x18] sm:$0xf]  ;;  %v1471_v9 = vld [vmem:[%s1902_s3 + $0x1c] sm:$0xf]  ;;  %s1491_s23 = scalar_lea.vmem %s1899_s0, %s1045_s15 }
  0x19   : > { %1933 = vst [vmem:[#allocation13_spill] sm:$0xff] %v1466_v8  ;;  %v1476_v10 = vld [vmem:[%s1902_s3 + $0x20] sm:$0xf]  ;;  %v1481_v11 = vld [vmem:[%s1902_s3 + $0x24] sm:$0xf] }
  0x1a   : > { %v1486_v12 = vld [vmem:[%s1902_s3 + $0x28] sm:$0xf]  ;;  %v1496_v13 = vld [vmem:[%s1902_s3 + $0x2c] sm:$0xf]  ;;  %v1501_v14 = vld [vmem:[%s1902_s3 + $0x30] sm:$0xf] }
  0x1b   : > { %v1506_v15 = vld [vmem:[%s1902_s3 + $0x34] sm:$0xf]  ;;  %v1511_v16 = vld [vmem:[%s1902_s3 + $0x38] sm:$0xf]  ;;  %v1516_v17 = vld [vmem:[%s1902_s3 + $0x3c] sm:$0xf] }
  0x1c   : > { %v1521_v18 = vld [vmem:[%s1904_s5] sm:$0xf]  ;;  %v1526_v19 = vld [vmem:[%s1904_s5 + $0x4] sm:$0xf]  ;;  %v1531_v20 = vld [vmem:[%s1904_s5 + $0x8] sm:$0xf] }
  0x1d   : > { %v1536_v21 = vld [vmem:[%s1904_s5 + $0xc] sm:$0xf]  ;;  %v1541_v22 = vld [vmem:[%s1904_s5 + $0x10] sm:$0xf]  ;;  %v1546_v23 = vld [vmem:[%s1904_s5 + $0x14] sm:$0xf] }
  0x1e   : > { %v1551_v24 = vld [vmem:[%s1904_s5 + $0x18] sm:$0xf]  ;;  %v1556_v25 = vld [vmem:[%s1904_s5 + $0x1c] sm:$0xf]  ;;  %v1561_v26 = vld [vmem:[%s1904_s5 + $0x20] sm:$0xf] }
  0x1f   : > { %v1566_v27 = vld [vmem:[%s1904_s5 + $0x24] sm:$0xf]  ;;  %v1571_v28 = vld [vmem:[%s1904_s5 + $0x28] sm:$0xf]  ;;  %v1576_v29 = vld [vmem:[%s1904_s5 + $0x2c] sm:$0xf] }
  0x20   : > { %v1581_v30 = vld [vmem:[%s1904_s5 + $0x30] sm:$0xf]  ;;  %v1586_v31 = vld [vmem:[%s1904_s5 + $0x34] sm:$0xf]  ;;  %v1591_v32 = vld [vmem:[%s1904_s5 + $0x38] sm:$0xf] }
  0x21   : > { %v1596_v33 = vld [vmem:[%s1904_s5 + $0x3c] sm:$0xf]  ;;  %v1601_v34 = vld [vmem:[%s1901_s2] ss:$0 sm:$0xff] }
  0x22   : > { %v1606_v35 = vld [vmem:[%s1903_s4] ss:$0 sm:$0xff] }
  0x23   : > { %v1611_v36 = vld [vmem:[%s1905_s6] ss:$0 sm:$0xff] }
  0x24 LB: >> { %v1934_v1 = vld [vmem:[#allocation6_spill] sm:$0xff]  ;;  %v1935_v0 = vld [vmem:[#allocation5_spill] sm:$0xff]  ;;  %vm387_vm0 = vcmask 1044480   ;;  %vm388_vm1 = vcmask 1045504   ;;  %v1325_v38 = vmov 65535   ;;  %v1066_v40 = vcombine.low %v1511_v16, %v1516_v17  ;;  %s1046_s18 = sshll.u32 %s1323_s17, 7  ;;  %s1323_s17 = sphi %s1614_s17, %s323_s17  }
  0x25   : >> { %v1049_v37 = vcombine.low %v1935_v0, %v1934_v1  ;;  %v389_v39 = vsel %vm387_vm0, 4294967295, %v1325_v38  ;;  %v1065_v41 = vcombine.low %v1501_v14, %v1506_v15  ;;  %s1627_s20 = scalar_lea.vmem %s1491_s23, %s1046_s18  ;;  %vm362_vm2 = vcmask 89088   ;;  %v1936_v8 = vld [vmem:[#allocation13_spill] sm:$0xff]  ;;  %v1937_v7 = vld [vmem:[#allocation12_spill] sm:$0xff]  ;;  %v1938_v6 = vld [vmem:[#allocation11_spill] sm:$0xff]  ;;  %s1047_s15 = sshll.u32 %s1323_s17, 3 }
  0x26   : >> { %v390_v42 = vsel %vm388_vm1, %v389_v39, 0  ;;  %1141 = vmatprep.subr.bf16.mxu1 %v1066_v40  ;;  %v327_v44 = vld [vmem:[%s1627_s20] sm:$0xff]  ;;  %v328_v45 = vld [vmem:[%s1627_s20 + $0x8] sm:$0xff]  ;;  %v329_v46 = vld [vmem:[%s1627_s20 + $0x10] sm:$0xff]  ;;  %v1064_v51 = vcombine.low %v1486_v12, %v1496_v13  ;;  %v1063_v54 = vcombine.low %v1476_v10, %v1481_v11  ;;  %v1062_v60 = vcombine.low %v1936_v8, %v1471_v9  ;;  %s952_s21 = scalar_lea.vmem %s272_s16, %s1047_s15 [#allocation2]  ;;  %s323_s17 = sadd.s32 1, %s1323_s17  }
  0x27   : >> { %v392_v43 = vand.u32 %v1049_v37, %v390_v42  ;;  %1142 = vmatpush3.bf16.msra.mxu1 %v1066_v40  ;;  %v343_v47 = vpack.c.bf16 %v328_v45, %v327_v44  ;;  %v330_v48 = vld [vmem:[%s1627_s20 + $0x18] sm:$0xff]  ;;  %v331_v49 = vld [vmem:[%s1627_s20 + $0x20] sm:$0xff]  ;;  %v332_v50 = vld [vmem:[%s1627_s20 + $0x28] sm:$0xff]  ;;  %v1061_v44 = vcombine.low %v1938_v6, %v1937_v7  ;;  %vm937_vm3 = vcmask 1041409   ;;  %p320_p11 = scmp.ge.s32.totalorder %s323_s17, 2  }
  0x28   : >> { %1143 = vmatprep.subr.bf16.mxu1 %v1065_v41  ;;  %v344_v52 = vpack.c.bf16 %v330_v48, %v329_v46  ;;  %v345_v53 = vpack.c.bf16 %v332_v50, %v331_v49  ;;  %v333_v55 = vld [vmem:[%s1627_s20 + $0x30] sm:$0xff]  ;;  %v334_v56 = vld [vmem:[%s1627_s20 + $0x38] sm:$0xff]  ;;  %v335_v57 = vld [vmem:[%s1627_s20 + $0x40] sm:$0xff]  ;;  %v1074_v48 = vcombine.low %v1581_v30, %v1586_v31  ;;  %v1073_v49 = vcombine.low %v1571_v28, %v1576_v29  ;;  %s1081_s22 = sshll.u32 (%p320_p11), %s1390_s28, 8  ;;  %s968_s9 = sshll.u32 (%p320_p11), %s272_s16, 4  ;;  %s1855_s9 = int_to_ptr.vmem [resolvable:$true] %s968_s9 }
  0x29   : >> { %1123 = vmatprep.subr.bf16.mxu0 %v392_v43  ;;  %1125 = vmatprep.mubr.msk.bf16.mxu0 %vm362_vm2, %v343_v47  ;;  %v336_v58 = vld [vmem:[%s1627_s20 + $0x48] sm:$0xff]  ;;  %v346_v59 = vpack.c.bf16 %v334_v56, %v333_v55  ;;  %v337_v62 = vld [vmem:[%s1627_s20 + $0x50] sm:$0xff]  ;;  %v338_v63 = vld [vmem:[%s1627_s20 + $0x58] sm:$0xff]  ;;  %v1075_v47 = vcombine.low %v1591_v32, %v1596_v33  ;;  %v1072_v50 = vcombine.low %v1561_v26, %v1566_v27  ;;  %vm939_vm4 = vcmask 1042434   ;;  %s1851_s14 = scalar_lea.hbm (%p320_p11), %s1906_s7, %s1081_s22  ;;  %s1859_s17 = scalar_lea.sflag (%p320_p11), [#allocation3], %s270_s13 }
  0x2a   : >> { %1124 = vmatpush3.bf16.msra.mxu0 %v392_v43  ;;  %v347_v61 = vpack.c.bf16 %v336_v58, %v335_v57  ;;  %v339_v37 = vld [vmem:[%s1627_s20 + $0x60] sm:$0xff]  ;;  %v340_v38 = vld [vmem:[%s1627_s20 + $0x68] sm:$0xff]  ;;  %v348_v39 = vpack.c.bf16 %v338_v63, %v337_v62  ;;  %v342_v42 = vld [vmem:[%s1627_s20 + $0x78] sm:$0xff]  ;;  %vm941_vm5 = vcmask 1043459   ;;  %vm943_vm6 = vcmask 1044484   ;;  %s1255_s23 = scalar_lea.vmem (%p320_p11), %s1855_s9, 256 }
  0x2b   : >> { %1144 = vmatpush3.bf16.msra.mxu1 %v1065_v41  ;;  %v349_v40 = vpack.c.bf16 %v340_v38, %v339_v37  ;;  %v341_v41 = vld [vmem:[%s1627_s20 + $0x70] sm:$0xff]  ;;  %v1939_v5 = vld [vmem:[#allocation10_spill] sm:$0xff]  ;;  %v1940_v4 = vld [vmem:[#allocation9_spill] sm:$0xff]  ;;  %1173 = vmatprep.subr.bf16.mxu0 %v1075_v47  ;;  %vm945_vm7 = vcmask 1045509   ;;  %vm947_vm8 = vcmask 1046534   ;;  %vm949_vm9 = vcmask 1047559   ;;  %p1256_p12 = scmp.ne.s32.totalorder (%p320_p11), %s1855_s9, %s1255_s23 }
  0x2c   : >> { %1145 = vmatprep.subr.bf16.mxu1 %v1064_v51  ;;  %v350_v43 = vpack.c.bf16 %v342_v42, %v341_v41  ;;  %v1060_v45 = vcombine.low %v1940_v4, %v1939_v5  ;;  %v1941_v3 = vld [vmem:[#allocation8_spill] sm:$0xff]  ;;  %v1942_v2 = vld [vmem:[#allocation7_spill] sm:$0xff]  ;;  %s1326_s28 = smov (%p320_p11), [#allocation2]  }
  0x2d   : >> { %1126 = vmatmul.mubr.msk.bf16.vlgmr.msra.gmra.mxu0 %vm362_vm2, %v344_v52  ;;  %v1059_v46 = vcombine.low %v1942_v2, %v1941_v3  ;;  %p1257_p13 = pnand (%p320_p11), %p1256_p12, %p1407_p5  ;;  %s1259_s18 = sshll.u32 (%p320_p11), %s1326_s28, 4  ;;  %s1260_s18 = int_to_ptr.vmem [resolvable:$false] %s1259_s18 }
  0x2e   : >> { %1129 = vmatprep.mubr.msk.bf16.mxu0 %vm362_vm2, %v345_v53  ;;  %1174 = vmatpush3.bf16.msra.mxu0 %v1075_v47  ;;  %s1261_s20 = scalar_lea.vmem (%p320_p11), %s1260_s18, 512  ;;  %p1262_p1 = scmp.lt.s32.totalorder (%p320_p11), %s1855_s9, %s1260_s18 }
  0x2f   : >> { %1146 = vmatpush3.bf16.msra.mxu1 %v1064_v51  ;;  %1175 = vmatprep.subr.bf16.mxu0 %v1074_v48  ;;  %v1071_v51 = vcombine.low %v1551_v24, %v1556_v25  ;;  %p1258_p0 = pneg (%p320_p11), %p1257_p13  ;;  %p1263_p2 = scmp.lt.s32.totalorder (%p320_p11), %s1261_s20, %s1255_s23 }
  0x30   : >> { %1147 = vmatprep.subr.bf16.mxu1 %v1063_v54 }
  0x31   : > { %p1264_p3 = por (%p320_p11), %p1263_p2, %p1262_p1 }
  0x32   : >> { %1176 = vmatpush3.bf16.msra.mxu0 %v1074_v48 }
  0x33   : >> { %1148 = vmatpush3.bf16.msra.mxu1 %v1063_v54  ;;  %1177 = vmatprep.subr.bf16.mxu0 %v1073_v49  ;;  %p1265_p4 = pnand (%p320_p11), %p1264_p3, %p1258_p0 }
  0x34   : >> { %1149 = vmatprep.subr.bf16.mxu1 %v1062_v60 }
  0x35   : >> { %1130 = vmatmul.mubr.msk.bf16.gmra.mxu0 %vm362_vm2, %v346_v59 }
  0x36   : >> { %1133 = vmatprep.mubr.msk.bf16.mxu0 %vm362_vm2, %v347_v61  ;;  %1178 = vmatpush3.bf16.msra.mxu0 %v1073_v49 }
  0x37   : >> { %1150 = vmatpush3.bf16.msra.mxu1 %v1062_v60  ;;  %1179 = vmatprep.subr.bf16.mxu0 %v1072_v50 }
  0x38   : >> { %1151 = vmatprep.subr.bf16.mxu1 %v1061_v44 }
  0x3a   : >> { %1180 = vmatpush3.bf16.msra.mxu0 %v1072_v50 }
  0x3b   : >> { %1152 = vmatpush3.bf16.msra.mxu1 %v1061_v44  ;;  %1181 = vmatprep.subr.bf16.mxu0 %v1071_v51 }
  0x3c   : >> { %1153 = vmatprep.subr.bf16.mxu1 %v1060_v45 }
  0x3d   : >> { %1134 = vmatmul.mubr.msk.bf16.gmra.mxu0 %vm362_vm2, %v348_v39 }
  0x3e   : >> { %1137 = vmatprep.mubr.msk.bf16.mxu0 %vm362_vm2, %v349_v40  ;;  %1182 = vmatpush3.bf16.msra.mxu0 %v1071_v51 }
  0x3f   : >> { %1154 = vmatpush3.bf16.msra.mxu1 %v1060_v45 }
  0x40   : >> { %1155 = vmatprep.subr.bf16.mxu1 %v1059_v46 }
  0x43   : >> { %1156 = vmatpush3.bf16.msra.mxu1 %v1059_v46 }
  0x45   : >> { %1138 = vmatmul.mubr.msk.bf16.gmra.mxu0 %vm362_vm2, %v350_v43 }
  0xed   : >> { %v1127_v52 = vpop.f32.mrf.mxu0 }
  0xee   : >> { %v1682_v57 = vadd.f32 %v1127_v52, %v1601_v34 }
  0xef   : >> { %v428_v53 = vpop.f32.mrf.mxu0 }
  0xf0   : >> { %v1676_v55 = vadd.f32 %v1601_v34, %v428_v53  ;;  %v1911_v37 = vmax.f32 %v1682_v57, 0.0 }
  0xf1   : >> { %v1128_v54 = vpop.f32.mrf.mxu0 }
  0xf2   : >> { %v1679_v56 = vadd.f32 %v1128_v54, %v1601_v34  ;;  %v1922_v62 = vmax.f32 %v1676_v55, 0.0 }
  0xf3   : >> { %v431_v58 = vpop.f32.mrf.mxu0 }
  0xf4   : >> { %v1685_v59 = vadd.f32 %v1601_v34, %v431_v58  ;;  %v1921_v60 = vmax.f32 %v1679_v56, 0.0 }
  0xf5   : >> { %v1131_v61 = vpop.f32.mrf.mxu0 }
  0xf6   : >> { %v1912_v63 = vmax.f32 %v1685_v59, 0.0  ;;  %v508_v40 = vpack.c.bf16 %v1921_v60, %v1911_v37  ;;  %v1706_v44 = vadd.f32 %v1131_v61, %v1601_v34 }
  0xf7   : >> { %v444_v38 = vpop.f32.mrf.mxu0 }
  0xf8   : >> { %v507_v39 = vpack.c.bf16 %v1912_v63, %v1922_v62  ;;  %v1700_v42 = vadd.f32 %v1601_v34, %v444_v38  ;;  %v1910_v51 = vmax.f32 %v1706_v44, 0.0 }
  0xf9   : >> { %v1132_v41 = vpop.f32.mrf.mxu0 }
  0xfa   : >> { %v1703_v43 = vadd.f32 %v1132_v41, %v1601_v34  ;;  %1157 = vmatprep.mubr.bf16.mxu1 %v507_v39  ;;  %v1909_v49 = vmax.f32 %v1700_v42, 0.0 }
  0xfb   : >> { %v447_v45 = vpop.f32.mrf.mxu0  ;;  %1158 = vmatmul.mubr.bf16.vlgmr.msra.gmra.mxu1 %v508_v40 }
  0xfc   : >> { %v1709_v46 = vadd.f32 %v1601_v34, %v447_v45  ;;  %v1908_v47 = vmax.f32 %v1703_v43, 0.0 }
  0xfd   : >> { %v1135_v48 = vpop.f32.mrf.mxu0 }
  0xfe   : >> { %v1907_v50 = vmax.f32 %v1709_v46, 0.0  ;;  %v510_v54 = vpack.c.bf16 %v1908_v47, %v1910_v51  ;;  %v1730_v39 = vadd.f32 %v1135_v48, %v1601_v34 }
  0xff   : >> { %v460_v52 = vpop.f32.mrf.mxu0 }
 0x100   : >> { %v509_v53 = vpack.c.bf16 %v1907_v50, %v1909_v49  ;;  %v1724_v61 = vadd.f32 %v1601_v34, %v460_v52  ;;  %v1916_v49 = vmax.f32 %v1730_v39, 0.0 }
 0x101   : >> { %v1136_v58 = vpop.f32.mrf.mxu0 }
 0x102   : >> { %v1727_v38 = vadd.f32 %v1136_v58, %v1601_v34  ;;  %1161 = vmatprep.mubr.bf16.mxu1 %v509_v53  ;;  %v1914_v47 = vmax.f32 %v1724_v61, 0.0 }
 0x103   : >> { %v463_v40 = vpop.f32.mrf.mxu0  ;;  %1162 = vmatmul.mubr.bf16.gmra.mxu1 %v510_v54 }
 0x104   : >> { %v1733_v41 = vadd.f32 %v1601_v34, %v463_v40  ;;  %v1915_v45 = vmax.f32 %v1727_v38, 0.0 }
 0x105   : >> { %v1139_v50 = vpop.f32.mrf.mxu0 }
 0x106   : >> { %v1913_v52 = vmax.f32 %v1733_v41, 0.0  ;;  %v512_v53 = vpack.c.bf16 %v1915_v45, %v1916_v49  ;;  %v1754_v37 = vadd.f32 %v1139_v50, %v1601_v34 }
 0x107   : >> { %v476_v58 = vpop.f32.mrf.mxu0 }
 0x108   : >> { %v511_v48 = vpack.c.bf16 %v1913_v52, %v1914_v47  ;;  %v1748_v40 = vadd.f32 %v1601_v34, %v476_v58  ;;  %v1920_v58 = vmax.f32 %v1754_v37, 0.0 }
 0x109   : >> { %v1140_v54 = vpop.f32.mrf.mxu0 }
 0x10a   : >> { %v1751_v51 = vadd.f32 %v1140_v54, %v1601_v34  ;;  %1165 = vmatprep.mubr.bf16.mxu1 %v511_v48  ;;  %v1918_v45 = vmax.f32 %v1748_v40, 0.0  ;;  %v1068_v54 = vcombine.low %v1521_v18, %v1526_v19 }
 0x10b   : >> { %v479_v63 = vpop.f32.mrf.mxu0  ;;  %1166 = vmatmul.mubr.bf16.gmra.mxu1 %v512_v53  ;;  %v1069_v53 = vcombine.low %v1531_v20, %v1536_v21 }
 0x10c   : >> { %v1757_v52 = vadd.f32 %v1601_v34, %v479_v63  ;;  %v1919_v47 = vmax.f32 %v1751_v51, 0.0  ;;  %v1070_v63 = vcombine.low %v1541_v22, %v1546_v23 }
 0x10e   : >> { %v1917_v49 = vmax.f32 %v1757_v52, 0.0  ;;  %v514_v50 = vpack.c.bf16 %v1919_v47, %v1920_v58  ;;  %1183 = vmatprep.subr.bf16.mxu0 %v1070_v63 }
 0x10f   : >> { %1184 = vmatpush3.bf16.msra.mxu0 %v1070_v63 }
 0x110   : >> { %v513_v48 = vpack.c.bf16 %v1917_v49, %v1918_v45  ;;  %1185 = vmatprep.subr.bf16.mxu0 %v1069_v53 }
 0x112   : >> { %1169 = vmatprep.mubr.bf16.mxu1 %v513_v48 }
 0x113   : >> { %1170 = vmatmul.mubr.bf16.gmra.mxu1 %v514_v50  ;;  %1186 = vmatpush3.bf16.msra.mxu0 %v1069_v53 }
 0x114   : >> { %1187 = vmatprep.subr.bf16.mxu0 %v1068_v54 }
 0x117   : >> { %1188 = vmatpush3.bf16.msra.mxu0 %v1068_v54 }
 0x1bb   : >> { %v1159_v49 = vpop.f32.mrf.mxu1 }
 0x1bc   : >> { %v612_v58 = vadd.f32 %v1159_v49, %v1606_v35 }
 0x1bd   : >> { %v603_v45 = vpop.f32.mrf.mxu1 }
 0x1be   : >> { %v604_v48 = vadd.f32 %v1606_v35, %v603_v45  ;;  %v668_v2 = vmax.f32 %v612_v58, 0.0 }
 0x1bf   : >> { %v1160_v47 = vpop.f32.mrf.mxu1 }
 0x1c0   : >> { %v615_v50 = vadd.f32 %v1160_v47, %v1606_v35  ;;  %v666_v53 = vmax.f32 %v604_v48, 0.0 }
 0x1c1   : >> { %v606_v63 = vpop.f32.mrf.mxu1 }
 0x1c2   : >> { %v607_v60 = vadd.f32 %v1606_v35, %v606_v63  ;;  %v669_v62 = vmax.f32 %v615_v50, 0.0 }
 0x1c3   : >> { %v1163_v0 = vpop.f32.mrf.mxu1 }
 0x1c4   : >> { %v667_v1 = vmax.f32 %v607_v60, 0.0  ;;  %v683_v54 = vpack.c.bf16 %v669_v62, %v668_v2  ;;  %v628_v47 = vadd.f32 %v1163_v0, %v1606_v35 }
 0x1c5   : >> { %v619_v3 = vpop.f32.mrf.mxu1 }
 0x1c6   : >> { %v682_v4 = vpack.c.bf16 %v667_v1, %v666_v53  ;;  %v620_v6 = vadd.f32 %v1606_v35, %v619_v3  ;;  %v672_v58 = vmax.f32 %v628_v47, 0.0 }
 0x1c7   : >> { %v1164_v5 = vpop.f32.mrf.mxu1 }
 0x1c8   : >> { %v631_v45 = vadd.f32 %v1164_v5, %v1606_v35  ;;  %1189 = vmatprep.mubr.bf16.mxu0 %v682_v4  ;;  %v670_v48 = vmax.f32 %v620_v6, 0.0 }
 0x1c9   : >> { %v622_v49 = vpop.f32.mrf.mxu1  ;;  %1190 = vmatmul.mubr.bf16.vlgmr.msra.gmra.mxu0 %v683_v54 }
 0x1ca   : >> { %v623_v63 = vadd.f32 %v1606_v35, %v622_v49  ;;  %v673_v50 = vmax.f32 %v631_v45, 0.0 }
 0x1cb   : >> { %v1167_v7 = vpop.f32.mrf.mxu1 }
 0x1cc   : >> { %v671_v60 = vmax.f32 %v623_v63, 0.0  ;;  %v685_v2 = vpack.c.bf16 %v673_v50, %v672_v58  ;;  %v644_v0 = vadd.f32 %v1167_v7, %v1606_v35 }
 0x1cd   : >> { %v635_v8 = vpop.f32.mrf.mxu1 }
 0x1ce   : >> { %v684_v1 = vpack.c.bf16 %v671_v60, %v670_v48  ;;  %v636_v3 = vadd.f32 %v1606_v35, %v635_v8  ;;  %v676_v47 = vmax.f32 %v644_v0, 0.0 }
 0x1cf   : >> { %v1168_v62 = vpop.f32.mrf.mxu1 }
 0x1d0   : >> { %v647_v5 = vadd.f32 %v1168_v62, %v1606_v35  ;;  %1193 = vmatprep.mubr.bf16.mxu0 %v684_v1  ;;  %v674_v6 = vmax.f32 %v636_v3, 0.0 }
 0x1d1   : >> { %v638_v4 = vpop.f32.mrf.mxu1  ;;  %1194 = vmatmul.mubr.bf16.gmra.mxu0 %v685_v2 }
 0x1d2   : >> { %v639_v53 = vadd.f32 %v1606_v35, %v638_v4  ;;  %v677_v54 = vmax.f32 %v647_v5, 0.0 }
 0x1d3   : >> { %v1171_v45 = vpop.f32.mrf.mxu1 }
 0x1d4   : >> { %v675_v49 = vmax.f32 %v639_v53, 0.0  ;;  %v687_v50 = vpack.c.bf16 %v677_v54, %v676_v47  ;;  %v660_v7 = vadd.f32 %v1171_v45, %v1606_v35 }
 0x1d5   : >> { %v651_v63 = vpop.f32.mrf.mxu1 }
 0x1d6   : >> { %v686_v48 = vpack.c.bf16 %v675_v49, %v674_v6  ;;  %v652_v8 = vadd.f32 %v1606_v35, %v651_v63  ;;  %v680_v4 = vmax.f32 %v660_v7, 0.0 }
 0x1d7   : >> { %v1172_v60 = vpop.f32.mrf.mxu1 }
 0x1d8   : >> { %v663_v58 = vadd.f32 %v1172_v60, %v1606_v35  ;;  %1197 = vmatprep.mubr.bf16.mxu0 %v686_v48  ;;  %v678_v5 = vmax.f32 %v652_v8, 0.0  ;;  %v1943_v60 = vmax.f32 %v1676_v55, 0.0 }
 0x1d9   : >> { %v654_v1 = vpop.f32.mrf.mxu1  ;;  %1198 = vmatmul.mubr.bf16.gmra.mxu0 %v687_v50 }
 0x1da   : >> { %v655_v2 = vadd.f32 %v1606_v35, %v654_v1  ;;  %v681_v62 = vmax.f32 %v663_v58, 0.0  ;;  %v1944_v58 = vmax.f32 %v1679_v56, 0.0  ;;  %v1947_v56 = vmax.f32 %v1706_v44, 0.0 }
 0x1dc   : >> { %v679_v3 = vmax.f32 %v655_v2, 0.0  ;;  %v689_v53 = vpack.c.bf16 %v681_v62, %v680_v4  ;;  %v1945_v2 = vmax.f32 %v1685_v59, 0.0 }
 0x1de   : >> { %v688_v0 = vpack.c.bf16 %v679_v3, %v678_v5  ;;  %v1946_v5 = vmax.f32 %v1682_v57, 0.0  ;;  %v1948_v57 = vmax.f32 %v1700_v42, 0.0 }
 0x1e0   : >> { %1201 = vmatprep.mubr.bf16.mxu0 %v688_v0 }
 0x1e1   : >> { %1202 = vmatmul.mubr.bf16.gmra.mxu0 %v689_v53 }
 0x289   : >> { %v1191_v54 = vpop.f32.mrf.mxu0 }
 0x28a   : >> { %v787_v45 = vadd.f32 %v1191_v54, %v1611_v36 }
 0x28b   : >> { %v778_v6 = vpop.f32.mrf.mxu0 }
 0x28c   : >> { %v779_v49 = vadd.f32 %v1611_v36, %v778_v6  ;;  %v843_v3 = vadd.f32 %v787_v45, %v1946_v5 }
 0x28d   : >> { %v1192_v47 = vpop.f32.mrf.mxu0 }
 0x28e   : >> { %v790_v63 = vadd.f32 %v1192_v47, %v1611_v36  ;;  %v841_v8 = vadd.f32 %v779_v49, %v1943_v60  ;;  %v859_v49 = vmax.f32 %v843_v3, 0.0 }
 0x28f   : >> { %v781_v48 = vpop.f32.mrf.mxu0 }
 0x290   : >> { %v782_v50 = vadd.f32 %v1611_v36, %v781_v48  ;;  %v844_v7 = vadd.f32 %v790_v63, %v1944_v58  ;;  %v857_v6 = vmax.f32 %v841_v8, 0.0 }
 0x291   : >> { %v1195_v1 = vpop.f32.mrf.mxu0 }
 0x292   : >> { %v842_v62 = vadd.f32 %v782_v50, %v1945_v2  ;;  %v803_v4 = vadd.f32 %v1195_v1, %v1611_v36  ;;  %v860_v47 = vmax.f32 %v844_v7, 0.0  ;;  %v1949_v1 = vmax.f32 %v1703_v43, 0.0 }
 0x293   : >> { %v794_v0 = vpop.f32.mrf.mxu0  ;;  %v1950_v7 = vmax.f32 %v1709_v46, 0.0 }
 0x294   : >> { %v858_v53 = vmax.f32 %v842_v62, 0.0  ;;  %v795_v54 = vadd.f32 %v1611_v36, %v794_v0  ;;  %v847_v63 = vadd.f32 %v803_v4, %v1947_v56  ;;  %v880_v58 = vmax.f32 %v859_v49, %v860_v47 }
 0x295   : >> { %v1196_v55 = vpop.f32.mrf.mxu0  ;;  %v1951_v56 = vmax.f32 %v1730_v39, 0.0 }
 0x296   : >> { %v873_v48 = vmax.f32 %v857_v6, %v858_v53  ;;  %v806_v59 = vadd.f32 %v1196_v55, %v1611_v36  ;;  %v845_v45 = vadd.f32 %v795_v54, %v1948_v57  ;;  %v863_v3 = vmax.f32 %v847_v63, 0.0 }
 0x297   : >> { %v797_v50 = vpop.f32.mrf.mxu0  ;;  %v881_v42 = vrot.slane %v880_v58, 4  ;;  %v1952_v57 = vmax.f32 %v1724_v61, 0.0 }
 0x298   : >> { %v798_v60 = vadd.f32 %v1611_v36, %v797_v50  ;;  %v848_v2 = vadd.f32 %v806_v59, %v1949_v1  ;;  %v874_v5 = vrot.slane %v873_v48, 4  ;;  %v861_v53 = vmax.f32 %v845_v45, 0.0 }
 0x299   : >> { %v1199_v8 = vpop.f32.mrf.mxu0  ;;  %v882_v1 = vmax.f32 %v880_v58, %v881_v42 }
 0x29a   : >> { %v846_v62 = vadd.f32 %v798_v60, %v1950_v7  ;;  %v864_v44 = vmax.f32 %v848_v2, 0.0  ;;  %v819_v4 = vadd.f32 %v1199_v8, %v1611_v36  ;;  %v875_v43 = vmax.f32 %v873_v48, %v874_v5 }
 0x29b   : >> { %v810_v0 = vpop.f32.mrf.mxu0  ;;  %v1953_v8 = vmax.f32 %v1727_v38, 0.0  ;;  %v1954_v48 = vmax.f32 %v1733_v41, 0.0 }
 0x29c   : >> { %v862_v6 = vmax.f32 %v846_v62, 0.0  ;;  %v894_v54 = vmax.f32 %v863_v3, %v864_v44  ;;  %v811_v55 = vadd.f32 %v1611_v36, %v810_v0  ;;  %v851_v59 = vadd.f32 %v819_v4, %v1951_v56 }
 0x29d   : >> { %v1200_v47 = vpop.f32.mrf.mxu0  ;;  %v876_v44 = vrot.slane %v875_v43, 2 }
 0x29e   : >> { %v887_v49 = vmax.f32 %v861_v53, %v862_v6  ;;  %v822_v46 = vadd.f32 %v1200_v47, %v1611_v36  ;;  %v849_v60 = vadd.f32 %v811_v55, %v1952_v57  ;;  %v895_v2 = vrot.slane %v894_v54, 4 }
 0x29f   : >> { %v813_v50 = vpop.f32.mrf.mxu0  ;;  %v867_v4 = vmax.f32 %v851_v59, 0.0  ;;  %v883_v47 = vrot.slane %v882_v1, 2 }
 0x2a0   : >> { %v888_v63 = vrot.slane %v887_v49, 4  ;;  %v814_v45 = vadd.f32 %v1611_v36, %v813_v50  ;;  %v852_v7 = vadd.f32 %v822_v46, %v1953_v8  ;;  %v865_v6 = vmax.f32 %v849_v60, 0.0 }
 0x2a1   : >> { %v1203_v62 = vpop.f32.mrf.mxu0  ;;  %v896_v58 = vmax.f32 %v894_v54, %v895_v2  ;;  %v1956_v60 = vmax.f32 %v1748_v40, 0.0  ;;  %v1957_v54 = vmax.f32 %v1751_v51, 0.0 }
 0x2a2   : >> { %v889_v3 = vmax.f32 %v887_v49, %v888_v63  ;;  %v850_v39 = vadd.f32 %v814_v45, %v1954_v48  ;;  %v835_v5 = vadd.f32 %v1203_v62, %v1611_v36  ;;  %v868_v0 = vmax.f32 %v852_v7, 0.0 }
 0x2a3   : >> { %v826_v53 = vpop.f32.mrf.mxu0  ;;  %v1955_v49 = vmax.f32 %v1754_v37, 0.0  ;;  %v877_v63 = vmax.f32 %v875_v43, %v876_v44  ;;  %v884_v48 = vmax.f32 %v882_v1, %v883_v47  ;;  %v1958_v43 = vmax.f32 %v1757_v52, 0.0 }
 0x2a4   : >> { %v890_v61 = vrot.slane %v889_v3, 2  ;;  %v866_v55 = vmax.f32 %v850_v39, 0.0  ;;  %v908_v42 = vmax.f32 %v867_v4, %v868_v0  ;;  %v827_v38 = vadd.f32 %v1611_v36, %v826_v53 }
 0x2a5   : >> { %v1204_v56 = vpop.f32.mrf.mxu0  ;;  %v855_v41 = vadd.f32 %v835_v5, %v1955_v49  ;;  %v897_v39 = vrot.slane %v896_v58, 2  ;;  %v878_v44 = vrot.slane %v877_v63, 1 }
 0x2a6   : >> { %v901_v46 = vmax.f32 %v865_v6, %v866_v55  ;;  %v838_v50 = vadd.f32 %v1204_v56, %v1611_v36  ;;  %v891_v57 = vmax.f32 %v889_v3, %v890_v61  ;;  %v909_v59 = vrot.slane %v908_v42, 4 }
 0x2a7   : >> { %v829_v45 = vpop.f32.mrf.mxu0  ;;  %v853_v7 = vadd.f32 %v827_v38, %v1956_v60  ;;  %v871_v5 = vmax.f32 %v855_v41, 0.0  ;;  %v885_v38 = vrot.slane %v884_v48, 1  ;;  %v898_v51 = vmax.f32 %v896_v58, %v897_v39 }
 0x2a8   : >> { %v902_v8 = vrot.slane %v901_v46, 4  ;;  %v856_v2 = vadd.f32 %v838_v50, %v1957_v54  ;;  %v830_v62 = vadd.f32 %v1611_v36, %v829_v45  ;;  %v910_v4 = vmax.f32 %v908_v42, %v909_v59 }
 0x2a9   : >> { %v892_v53 = vrot.slane %v891_v57, 1  ;;  %v869_v6 = vmax.f32 %v853_v7, 0.0  ;;  %v879_v47 = vmax.f32 %v877_v63, %v878_v44  ;;  %v886_v52 = vmax.f32 %v884_v48, %v885_v38 }
 0x2aa   : >> { %v903_v37 = vmax.f32 %v901_v46, %v902_v8  ;;  %v872_v0 = vmax.f32 %v856_v2, 0.0  ;;  %v854_v3 = vadd.f32 %v830_v62, %v1958_v43  ;;  %v911_v56 = vrot.slane %v910_v4, 2 }
 0x2ab   : >> { %v893_v42 = vmax.f32 %v891_v57, %v892_v53  ;;  %v899_v45 = vrot.slane %v898_v51, 1  ;;  %v938_v54 = vsel %vm937_vm3, %v886_v52, %v879_v47 }
 0x2ac   : >> { %v904_v61 = vrot.slane %v903_v37, 2  ;;  %v922_v40 = vmax.f32 %v871_v5, %v872_v0  ;;  %v870_v55 = vmax.f32 %v854_v3, 0.0  ;;  %v912_v8 = vmax.f32 %v910_v4, %v911_v56 }
 0x2ad   : >> { %v940_v58 = vsel %vm939_vm4, %v893_v42, %v938_v54 }
 0x2ae   : >> { %v905_v49 = vmax.f32 %v903_v37, %v904_v61  ;;  %v923_v50 = vrot.slane %v922_v40, 4  ;;  %v915_v1 = vmax.f32 %v869_v6, %v870_v55  ;;  %v900_v37 = vmax.f32 %v898_v51, %v899_v45 }
 0x2af   : >> { %v913_v63 = vrot.slane %v912_v8, 1 }
 0x2b0   : >> { %v906_v46 = vrot.slane %v905_v49, 1  ;;  %v924_v41 = vmax.f32 %v922_v40, %v923_v50  ;;  %v916_v59 = vrot.slane %v915_v1, 4  ;;  %v942_v5 = vsel %vm941_vm5, %v900_v37, %v940_v58 }
 0x2b1   : >> { %v914_v4 = vmax.f32 %v912_v8, %v913_v63 }
 0x2b2   : >> { %v925_v60 = vrot.slane %v924_v41, 2  ;;  %v917_v7 = vmax.f32 %v915_v1, %v916_v59  ;;  %v907_v2 = vmax.f32 %v905_v49, %v906_v46 }
 0x2b4   : >> { %v926_v62 = vmax.f32 %v924_v41, %v925_v60  ;;  %v918_v39 = vrot.slane %v917_v7, 2  ;;  %v944_v48 = vsel %vm943_vm6, %v907_v2, %v942_v5 }
 0x2b5   : >> { %v946_v53 = vsel %vm945_vm7, %v914_v4, %v944_v48 }
 0x2b6   : >> { %v919_v57 = vmax.f32 %v917_v7, %v918_v39  ;;  %v927_v0 = vrot.slane %v926_v62, 1 }
 0x2b8   : >> { %v920_v43 = vrot.slane %v919_v57, 1  ;;  %v928_v44 = vmax.f32 %v926_v62, %v927_v0 }
 0x2ba   : >> { %v921_v3 = vmax.f32 %v919_v57, %v920_v43  ;;  %322 = sbr.rel (!%p320_p11) target bundleno = 36 (0x24), region = 92 }
 0x2bc   : >> { %v948_v61 = vsel %vm947_vm8, %v921_v3, %v946_v53 }
 0x2bd   : >> { %v950_v6 = vsel %vm949_vm9, %v928_v44, %v948_v61 }
 0x2be   : >> { %953 = vst [vmem:[%s952_s21] sm:$0xff] %v950_v6 }
 0x2bf   : > { %1268 = shalt.err (!%p1265_p4)
}
 0x2c0   : > { %s1269_s13 = scalar_lea.hbm %s1851_s14, 256  ;;  %s1273_s15 = scalar_lea.hbm %s1906_s7, 512 }
 0x2c1   : > { %p1270_p7 = scmp.ne.s32.totalorder %s1851_s14, %s1269_s13  ;;  %p1274_p10 = scmp.lt.s32.totalorder %s1851_s14, %s1906_s7 }
 0x2c2   : > { %p1275_p11 = scmp.lt.s32.totalorder %s1273_s15, %s1269_s13 }
 0x2c3   : > { %p1271_p8 = pnand %p1270_p7, %p1407_p5 }
 0x2c4   : > { %p1276_p12 = por %p1275_p11, %p1274_p10 }
 0x2c5   : > { %p1272_p9 = pneg %p1271_p8 }
 0x2c7   : > { %p1277_p13 = pnand %p1276_p12, %p1272_p9 }
 0x2c9   : > { %1280 = shalt.err (!%p1277_p13)
}
 0x2ca   : > { %s1327_s29 = smov 128   ;;  %s1328_s8 = smov 8  }
 0x2cb   : > { %1205 = dma.vmem_to_hbm [thread:$0]  (%p1407_p5), %s1855_s9, 256, %s1851_s14, %s1859_s17, %s1327_s29, %s1327_s29, %s1328_s8  }
 0x2cc PF: > { %p1211_p0 = scmp.ge.s32.totalorder %s1319_s27, 2  ;;  %s983_s23 = sand.u32 1, %s1307_s24  }
 0x2cd   : > { %s984_s28 = scalar_lea.sflag [#allocation3], %s983_s23 }
 0x2ce   : > { %p1208_p1 = pnand %p1211_p0, %p1411_p6 }
 0x2d0   : > { %p1209_p2 = pneg %p1208_p1 }
 0x2d2   : > { %1302 = dma.done.wait (%p1209_p2), %s984_s28, 256  }
 0x2d3   : > { %1304 = vsyncadd (%p1209_p2), %s984_s28, 4294967040  ;;  %p17_p3 = scmp.ge.s32.totalorder %s1394_s30, 4   ;;  %s1959_s24 = smov %s1311_s25 }
 0x2d4   : > { %s1960_s25 = smov %s1315_s26  ;;  %s1961_s26 = smov %s1405_s10 }
 0x2d5   : > { %s1962_s27 = smov %s1394_s30  ;;  %19 = sbr.rel (!%p17_p3) target bundleno = 3 (0x3), region = 103 }
 0x2da   :  { %989 = vsyncpa [#allocation3], 1 }
 0x2db   :  { %991 = vsyncpa [#allocation3 + $0x1], 1 }

// kernel: tpu_custom_call.1
= control target key start
LH: loop header
LB: loop body
LE: loop exit
PB: predicated region body
PF: predicated region fallthrough
CT: control target
= control target key end

     0   :  { %12 = vsyncpa [#allocation3], 0  ;;  %s1899_s0 = inlined_call_operand.vmem [shape: f32[512,11], index: 0, kind: input, shape index: {}]   ;;  %s1900_s1 = inlined_call_operand.vmem [shape: bf16[11,128], index: 1, kind: input, shape index: {}]   ;;  %s1901_s2 = inlined_call_operand.vmem [shape: f32[1,128], index: 2, kind: input, shape index: {}]   ;;  %s1902_s3 = inlined_call_operand.vmem [shape: bf16[128,128], index: 3, kind: input, shape index: {}]   ;;  %s1903_s4 = inlined_call_operand.vmem [shape: f32[1,128], index: 4, kind: input, shape index: {}]   ;;  %s1904_s5 = inlined_call_operand.vmem [shape: bf16[128,128], index: 5, kind: input, shape index: {}]   ;;  %s1905_s6 = inlined_call_operand.vmem [shape: f32[1,128], index: 6, kind: input, shape index: {}]   ;;  %s1906_s7 = inlined_call_operand.hbm [shape: f32[32,128], index: 7, kind: output, shape index: {}]  }
   0x1   :  { %14 = vsyncpa [#allocation3 + $0x1], 0  ;;  %s1369_s24 = smov 0   ;;  %s1371_s25 = smov 0  }
   0x2   :  { %s1373_s26 = smov 0   ;;  %s1375_s27 = smov 0  }
   0x3 LB: > { %s1390_s28 = sadd.s32 4294967295, %s1319_s27   ;;  %s1039_s29 = sadd.s32 4294967294, %s1319_s27   ;;  %s1319_s27 = sphi %s1375_s27, %s1962_s27   ;;  %s1315_s26 = sphi %s1373_s26, %s1961_s26   ;;  %s1311_s25 = sphi %s1371_s25, %s1960_s25   ;;  %s1307_s24 = sphi %s1369_s24, %s1959_s24  }
   0x4   : > { %s1394_s30 = sadd.s32 1, %s1319_s27   ;;  %s179_s8 = sadd.s32 1, %s1315_s26 }
   0x5   : > { %s176_s9 = ssub.s32 %s1319_s27, %s1394_s30  ;;  %p189_p0 = scmp.ne.s32.totalorder %s1315_s26, %s1311_s25 }
   0x6   : > { %p177_p1 = scmp.eq.s32.totalorder %s176_s9, 0  ;;  %p190_p2 = scmp.eq.s32.totalorder %s1390_s28, 1 }
   0x7   : > { %p195_p3 = scmp.ne.s32.totalorder %s1311_s25, %s1307_s24  ;;  %p196_p4 = scmp.eq.s32.totalorder %s1039_s29, 1 }
   0x8   : > { %s1405_s10 = scalar_select %p177_p1, %s1315_s26, %s179_s8  }
   0x9   : > { %p1407_p5 = por %p190_p2, %p189_p0  ;;  %p1411_p6 = por %p196_p4, %p195_p3 }
   0xa   : > { %p1042_p7 = scmp.ge.s32.totalorder %s1319_s27, 1  ;;  %p241_p8 = scmp.lt.s32.totalorder %s1319_s27, 3 }
   0xc   : > { %p242_p9 = pnand %p1042_p7, %p241_p8 }
   0xe   : > { %245 = sbr.rel (%p242_p9) target bundleno = 716 (0x2cc), region = 48 }
  0x13   : > { %s270_s13 = sand.u32 1, %s1311_s25   ;;  %s1044_s14 = sshll.u32 %s1390_s28, 5  ;;  %v1422_v0 = vld [vmem:[%s1900_s1] sm:$0xf]  ;;  %v1427_v1 = vld [vmem:[%s1900_s1 + $0x4] sm:$0x3] }
  0x14   : > { %1925 = vst [vmem:[#allocation5_spill] sm:$0xff] %v1422_v0  ;;  %1926 = vst [vmem:[#allocation6_spill] sm:$0xff] %v1427_v1  ;;  %s1431_s19 = sshll.u32 %s270_s13, 4  ;;  %p274_p10 = scmp.lt.s32.totalorder %s1044_s14, 63  ;;  %v1436_v2 = vld [vmem:[%s1902_s3] sm:$0xf] }
  0x15   : > { %1927 = vst [vmem:[#allocation7_spill] sm:$0xff] %v1436_v2  ;;  %v1441_v3 = vld [vmem:[%s1902_s3 + $0x4] sm:$0xf]  ;;  %v1446_v4 = vld [vmem:[%s1902_s3 + $0x8] sm:$0xf]  ;;  %s272_s16 = scalar_lea.vmem [#allocation2], %s1431_s19 }
  0x16   : > { %1928 = vst [vmem:[#allocation8_spill] sm:$0xff] %v1441_v3  ;;  %1929 = vst [vmem:[#allocation9_spill] sm:$0xff] %v1446_v4  ;;  %v1451_v5 = vld [vmem:[%s1902_s3 + $0xc] sm:$0xf]  ;;  %s1964_s14 = smov (!%p274_p10, %s1044_s14), 63  ;;  %s1614_s17 = smov 0  }
  0x17   : > { %1930 = vst [vmem:[#allocation10_spill] sm:$0xff] %v1451_v5  ;;  %v1456_v6 = vld [vmem:[%s1902_s3 + $0x10] sm:$0xf]  ;;  %v1461_v7 = vld [vmem:[%s1902_s3 + $0x14] sm:$0xf]  ;;  %s1045_s15 = sshll.u32 %s1964_s14, 3 }
  0x18   : > { %1931 = vst [vmem:[#allocation11_spill] sm:$0xff] %v1456_v6  ;;  %1932 = vst [vmem:[#allocation12_spill] sm:$0xff] %v1461_v7  ;;  %v1466_v8 = vld [vmem:[%s1902_s3 + $0x18] sm:$0xf]  ;;  %v1471_v9 = vld [vmem:[%s1902_s3 + $0x1c] sm:$0xf]  ;;  %s1491_s23 = scalar_lea.vmem %s1899_s0, %s1045_s15 }
  0x19   : > { %1933 = vst [vmem:[#allocation13_spill] sm:$0xff] %v1466_v8  ;;  %v1476_v10 = vld [vmem:[%s1902_s3 + $0x20] sm:$0xf]  ;;  %v1481_v11 = vld [vmem:[%s1902_s3 + $0x24] sm:$0xf] }
  0x1a   : > { %v1486_v12 = vld [vmem:[%s1902_s3 + $0x28] sm:$0xf]  ;;  %v1496_v13 = vld [vmem:[%s1902_s3 + $0x2c] sm:$0xf]  ;;  %v1501_v14 = vld [vmem:[%s1902_s3 + $0x30] sm:$0xf] }
  0x1b   : > { %v1506_v15 = vld [vmem:[%s1902_s3 + $0x34] sm:$0xf]  ;;  %v1511_v16 = vld [vmem:[%s1902_s3 + $0x38] sm:$0xf]  ;;  %v1516_v17 = vld [vmem:[%s1902_s3 + $0x3c] sm:$0xf] }
  0x1c   : > { %v1521_v18 = vld [vmem:[%s1904_s5] sm:$0xf]  ;;  %v1526_v19 = vld [vmem:[%s1904_s5 + $0x4] sm:$0xf]  ;;  %v1531_v20 = vld [vmem:[%s1904_s5 + $0x8] sm:$0xf] }
  0x1d   : > { %v1536_v21 = vld [vmem:[%s1904_s5 + $0xc] sm:$0xf]  ;;  %v1541_v22 = vld [vmem:[%s1904_s5 + $0x10] sm:$0xf]  ;;  %v1546_v23 = vld [vmem:[%s1904_s5 + $0x14] sm:$0xf] }
  0x1e   : > { %v1551_v24 = vld [vmem:[%s1904_s5 + $0x18] sm:$0xf]  ;;  %v1556_v25 = vld [vmem:[%s1904_s5 + $0x1c] sm:$0xf]  ;;  %v1561_v26 = vld [vmem:[%s1904_s5 + $0x20] sm:$0xf] }
  0x1f   : > { %v1566_v27 = vld [vmem:[%s1904_s5 + $0x24] sm:$0xf]  ;;  %v1571_v28 = vld [vmem:[%s1904_s5 + $0x28] sm:$0xf]  ;;  %v1576_v29 = vld [vmem:[%s1904_s5 + $0x2c] sm:$0xf] }
  0x20   : > { %v1581_v30 = vld [vmem:[%s1904_s5 + $0x30] sm:$0xf]  ;;  %v1586_v31 = vld [vmem:[%s1904_s5 + $0x34] sm:$0xf]  ;;  %v1591_v32 = vld [vmem:[%s1904_s5 + $0x38] sm:$0xf] }
  0x21   : > { %v1596_v33 = vld [vmem:[%s1904_s5 + $0x3c] sm:$0xf]  ;;  %v1601_v34 = vld [vmem:[%s1901_s2] ss:$0 sm:$0xff] }
  0x22   : > { %v1606_v35 = vld [vmem:[%s1903_s4] ss:$0 sm:$0xff] }
  0x23   : > { %v1611_v36 = vld [vmem:[%s1905_s6] ss:$0 sm:$0xff] }
  0x24 LB: >> { %v1934_v1 = vld [vmem:[#allocation6_spill] sm:$0xff]  ;;  %v1935_v0 = vld [vmem:[#allocation5_spill] sm:$0xff]  ;;  %vm387_vm0 = vcmask 1044480   ;;  %vm388_vm1 = vcmask 1045504   ;;  %v1325_v38 = vmov 65535   ;;  %v1066_v40 = vcombine.low %v1511_v16, %v1516_v17  ;;  %s1046_s18 = sshll.u32 %s1323_s17, 7  ;;  %s1323_s17 = sphi %s1614_s17, %s323_s17  }
  0x25   : >> { %v1049_v37 = vcombine.low %v1935_v0, %v1934_v1  ;;  %v389_v39 = vsel %vm387_vm0, 4294967295, %v1325_v38  ;;  %v1065_v41 = vcombine.low %v1501_v14, %v1506_v15  ;;  %s1627_s20 = scalar_lea.vmem %s1491_s23, %s1046_s18  ;;  %vm362_vm2 = vcmask 89088   ;;  %v1936_v8 = vld [vmem:[#allocation13_spill] sm:$0xff]  ;;  %v1937_v7 = vld [vmem:[#allocation12_spill] sm:$0xff]  ;;  %v1938_v6 = vld [vmem:[#allocation11_spill] sm:$0xff]  ;;  %s1047_s15 = sshll.u32 %s1323_s17, 3 }
  0x26   : >> { %v390_v42 = vsel %vm388_vm1, %v389_v39, 0  ;;  %1141 = vmatprep.subr.bf16.mxu1 %v1066_v40  ;;  %v327_v44 = vld [vmem:[%s1627_s20] sm:$0xff]  ;;  %v328_v45 = vld [vmem:[%s1627_s20 + $0x8] sm:$0xff]  ;;  %v329_v46 = vld [vmem:[%s1627_s20 + $0x10] sm:$0xff]  ;;  %v1064_v51 = vcombine.low %v1486_v12, %v1496_v13  ;;  %v1063_v54 = vcombine.low %v1476_v10, %v1481_v11  ;;  %v1062_v60 = vcombine.low %v1936_v8, %v1471_v9  ;;  %s952_s21 = scalar_lea.vmem %s272_s16, %s1047_s15 [#allocation2]  ;;  %s323_s17 = sadd.s32 1, %s1323_s17  }
  0x27   : >> { %v392_v43 = vand.u32 %v1049_v37, %v390_v42  ;;  %1142 = vmatpush3.bf16.msra.mxu1 %v1066_v40  ;;  %v343_v47 = vpack.c.bf16 %v328_v45, %v327_v44  ;;  %v330_v48 = vld [vmem:[%s1627_s20 + $0x18] sm:$0xff]  ;;  %v331_v49 = vld [vmem:[%s1627_s20 + $0x20] sm:$0xff]  ;;  %v332_v50 = vld [vmem:[%s1627_s20 + $0x28] sm:$0xff]  ;;  %v1061_v44 = vcombine.low %v1938_v6, %v1937_v7  ;;  %vm937_vm3 = vcmask 1041409   ;;  %p320_p11 = scmp.ge.s32.totalorder %s323_s17, 2  }
  0x28   : >> { %1143 = vmatprep.subr.bf16.mxu1 %v1065_v41  ;;  %v344_v52 = vpack.c.bf16 %v330_v48, %v329_v46  ;;  %v345_v53 = vpack.c.bf16 %v332_v50, %v331_v49  ;;  %v333_v55 = vld [vmem:[%s1627_s20 + $0x30] sm:$0xff]  ;;  %v334_v56 = vld [vmem:[%s1627_s20 + $0x38] sm:$0xff]  ;;  %v335_v57 = vld [vmem:[%s1627_s20 + $0x40] sm:$0xff]  ;;  %v1074_v48 = vcombine.low %v1581_v30, %v1586_v31  ;;  %v1073_v49 = vcombine.low %v1571_v28, %v1576_v29  ;;  %s1081_s22 = sshll.u32 (%p320_p11), %s1390_s28, 8  ;;  %s968_s9 = sshll.u32 (%p320_p11), %s272_s16, 4  ;;  %s1855_s9 = int_to_ptr.vmem [resolvable:$true] %s968_s9 }
  0x29   : >> { %1123 = vmatprep.subr.bf16.mxu0 %v392_v43  ;;  %1125 = vmatprep.mubr.msk.bf16.mxu0 %vm362_vm2, %v343_v47  ;;  %v336_v58 = vld [vmem:[%s1627_s20 + $0x48] sm:$0xff]  ;;  %v346_v59 = vpack.c.bf16 %v334_v56, %v333_v55  ;;  %v337_v62 = vld [vmem:[%s1627_s20 + $0x50] sm:$0xff]  ;;  %v338_v63 = vld [vmem:[%s1627_s20 + $0x58] sm:$0xff]  ;;  %v1075_v47 = vcombine.low %v1591_v32, %v1596_v33  ;;  %v1072_v50 = vcombine.low %v1561_v26, %v1566_v27  ;;  %vm939_vm4 = vcmask 1042434   ;;  %s1851_s14 = scalar_lea.hbm (%p320_p11), %s1906_s7, %s1081_s22  ;;  %s1859_s17 = scalar_lea.sflag (%p320_p11), [#allocation3], %s270_s13 }
  0x2a   : >> { %1124 = vmatpush3.bf16.msra.mxu0 %v392_v43  ;;  %v347_v61 = vpack.c.bf16 %v336_v58, %v335_v57  ;;  %v339_v37 = vld [vmem:[%s1627_s20 + $0x60] sm:$0xff]  ;;  %v340_v38 = vld [vmem:[%s1627_s20 + $0x68] sm:$0xff]  ;;  %v348_v39 = vpack.c.bf16 %v338_v63, %v337_v62  ;;  %v342_v42 = vld [vmem:[%s1627_s20 + $0x78] sm:$0xff]  ;;  %vm941_vm5 = vcmask 1043459   ;;  %vm943_vm6 = vcmask 1044484   ;;  %s1255_s23 = scalar_lea.vmem (%p320_p11), %s1855_s9, 256 }
  0x2b   : >> { %1144 = vmatpush3.bf16.msra.mxu1 %v1065_v41  ;;  %v349_v40 = vpack.c.bf16 %v340_v38, %v339_v37  ;;  %v341_v41 = vld [vmem:[%s1627_s20 + $0x70] sm:$0xff]  ;;  %v1939_v5 = vld [vmem:[#allocation10_spill] sm:$0xff]  ;;  %v1940_v4 = vld [vmem:[#allocation9_spill] sm:$0xff]  ;;  %1173 = vmatprep.subr.bf16.mxu0 %v1075_v47  ;;  %vm945_vm7 = vcmask 1045509   ;;  %vm947_vm8 = vcmask 1046534   ;;  %vm949_vm9 = vcmask 1047559   ;;  %p1256_p12 = scmp.ne.s32.totalorder (%p320_p11), %s1855_s9, %s1255_s23 }
  0x2c   : >> { %1145 = vmatprep.subr.bf16.mxu1 %v1064_v51  ;;  %v350_v43 = vpack.c.bf16 %v342_v42, %v341_v41  ;;  %v1060_v45 = vcombine.low %v1940_v4, %v1939_v5  ;;  %v1941_v3 = vld [vmem:[#allocation8_spill] sm:$0xff]  ;;  %v1942_v2 = vld [vmem:[#allocation7_spill] sm:$0xff]  ;;  %s1326_s28 = smov (%p320_p11), [#allocation2]  }
  0x2d   : >> { %1126 = vmatmul.mubr.msk.bf16.vlgmr.msra.gmra.mxu0 %vm362_vm2, %v344_v52  ;;  %v1059_v46 = vcombine.low %v1942_v2, %v1941_v3  ;;  %p1257_p13 = pnand (%p320_p11), %p1256_p12, %p1407_p5  ;;  %s1259_s18 = sshll.u32 (%p320_p11), %s1326_s28, 4  ;;  %s1260_s18 = int_to_ptr.vmem [resolvable:$false] %s1259_s18 }
  0x2e   : >> { %1129 = vmatprep.mubr.msk.bf16.mxu0 %vm362_vm2, %v345_v53  ;;  %1174 = vmatpush3.bf16.msra.mxu0 %v1075_v47  ;;  %s1261_s20 = scalar_lea.vmem (%p320_p11), %s1260_s18, 512  ;;  %p1262_p1 = scmp.lt.s32.totalorder (%p320_p11), %s1855_s9, %s1260_s18 }
  0x2f   : >> { %1146 = vmatpush3.bf16.msra.mxu1 %v1064_v51  ;;  %1175 = vmatprep.subr.bf16.mxu0 %v1074_v48  ;;  %v1071_v51 = vcombine.low %v1551_v24, %v1556_v25  ;;  %p1258_p0 = pneg (%p320_p11), %p1257_p13  ;;  %p1263_p2 = scmp.lt.s32.totalorder (%p320_p11), %s1261_s20, %s1255_s23 }
  0x30   : >> { %1147 = vmatprep.subr.bf16.mxu1 %v1063_v54 }
  0x31   : > { %p1264_p3 = por (%p320_p11), %p1263_p2, %p1262_p1 }
  0x32   : >> { %1176 = vmatpush3.bf16.msra.mxu0 %v1074_v48 }
  0x33   : >> { %1148 = vmatpush3.bf16.msra.mxu1 %v1063_v54  ;;  %1177 = vmatprep.subr.bf16.mxu0 %v1073_v49  ;;  %p1265_p4 = pnand (%p320_p11), %p1264_p3, %p1258_p0 }
  0x34   : >> { %1149 = vmatprep.subr.bf16.mxu1 %v1062_v60 }
  0x35   : >> { %1130 = vmatmul.mubr.msk.bf16.gmra.mxu0 %vm362_vm2, %v346_v59 }
  0x36   : >> { %1133 = vmatprep.mubr.msk.bf16.mxu0 %vm362_vm2, %v347_v61  ;;  %1178 = vmatpush3.bf16.msra.mxu0 %v1073_v49 }
  0x37   : >> { %1150 = vmatpush3.bf16.msra.mxu1 %v1062_v60  ;;  %1179 = vmatprep.subr.bf16.mxu0 %v1072_v50 }
  0x38   : >> { %1151 = vmatprep.subr.bf16.mxu1 %v1061_v44 }
  0x3a   : >> { %1180 = vmatpush3.bf16.msra.mxu0 %v1072_v50 }
  0x3b   : >> { %1152 = vmatpush3.bf16.msra.mxu1 %v1061_v44  ;;  %1181 = vmatprep.subr.bf16.mxu0 %v1071_v51 }
  0x3c   : >> { %1153 = vmatprep.subr.bf16.mxu1 %v1060_v45 }
  0x3d   : >> { %1134 = vmatmul.mubr.msk.bf16.gmra.mxu0 %vm362_vm2, %v348_v39 }
  0x3e   : >> { %1137 = vmatprep.mubr.msk.bf16.mxu0 %vm362_vm2, %v349_v40  ;;  %1182 = vmatpush3.bf16.msra.mxu0 %v1071_v51 }
  0x3f   : >> { %1154 = vmatpush3.bf16.msra.mxu1 %v1060_v45 }
  0x40   : >> { %1155 = vmatprep.subr.bf16.mxu1 %v1059_v46 }
  0x43   : >> { %1156 = vmatpush3.bf16.msra.mxu1 %v1059_v46 }
  0x45   : >> { %1138 = vmatmul.mubr.msk.bf16.gmra.mxu0 %vm362_vm2, %v350_v43 }
  0xed   : >> { %v1127_v52 = vpop.f32.mrf.mxu0 }
  0xee   : >> { %v1682_v57 = vadd.f32 %v1127_v52, %v1601_v34 }
  0xef   : >> { %v428_v53 = vpop.f32.mrf.mxu0 }
  0xf0   : >> { %v1676_v55 = vadd.f32 %v1601_v34, %v428_v53  ;;  %v1911_v37 = vmax.f32 %v1682_v57, 0.0 }
  0xf1   : >> { %v1128_v54 = vpop.f32.mrf.mxu0 }
  0xf2   : >> { %v1679_v56 = vadd.f32 %v1128_v54, %v1601_v34  ;;  %v1922_v62 = vmax.f32 %v1676_v55, 0.0 }
  0xf3   : >> { %v431_v58 = vpop.f32.mrf.mxu0 }
  0xf4   : >> { %v1685_v59 = vadd.f32 %v1601_v34, %v431_v58  ;;  %v1921_v60 = vmax.f32 %v1679_v56, 0.0 }
  0xf5   : >> { %v1131_v61 = vpop.f32.mrf.mxu0 }
  0xf6   : >> { %v1912_v63 = vmax.f32 %v1685_v59, 0.0  ;;  %v508_v40 = vpack.c.bf16 %v1921_v60, %v1911_v37  ;;  %v1706_v44 = vadd.f32 %v1131_v61, %v1601_v34 }
  0xf7   : >> { %v444_v38 = vpop.f32.mrf.mxu0 }
  0xf8   : >> { %v507_v39 = vpack.c.bf16 %v1912_v63, %v1922_v62  ;;  %v1700_v42 = vadd.f32 %v1601_v34, %v444_v38  ;;  %v1910_v51 = vmax.f32 %v1706_v44, 0.0 }
  0xf9   : >> { %v1132_v41 = vpop.f32.mrf.mxu0 }
  0xfa   : >> { %v1703_v43 = vadd.f32 %v1132_v41, %v1601_v34  ;;  %1157 = vmatprep.mubr.bf16.mxu1 %v507_v39  ;;  %v1909_v49 = vmax.f32 %v1700_v42, 0.0 }
  0xfb   : >> { %v447_v45 = vpop.f32.mrf.mxu0  ;;  %1158 = vmatmul.mubr.bf16.vlgmr.msra.gmra.mxu1 %v508_v40 }
  0xfc   : >> { %v1709_v46 = vadd.f32 %v1601_v34, %v447_v45  ;;  %v1908_v47 = vmax.f32 %v1703_v43, 0.0 }
  0xfd   : >> { %v1135_v48 = vpop.f32.mrf.mxu0 }
  0xfe   : >> { %v1907_v50 = vmax.f32 %v1709_v46, 0.0  ;;  %v510_v54 = vpack.c.bf16 %v1908_v47, %v1910_v51  ;;  %v1730_v39 = vadd.f32 %v1135_v48, %v1601_v34 }
  0xff   : >> { %v460_v52 = vpop.f32.mrf.mxu0 }
 0x100   : >> { %v509_v53 = vpack.c.bf16 %v1907_v50, %v1909_v49  ;;  %v1724_v61 = vadd.f32 %v1601_v34, %v460_v52  ;;  %v1916_v49 = vmax.f32 %v1730_v39, 0.0 }
 0x101   : >> { %v1136_v58 = vpop.f32.mrf.mxu0 }
 0x102   : >> { %v1727_v38 = vadd.f32 %v1136_v58, %v1601_v34  ;;  %1161 = vmatprep.mubr.bf16.mxu1 %v509_v53  ;;  %v1914_v47 = vmax.f32 %v1724_v61, 0.0 }
 0x103   : >> { %v463_v40 = vpop.f32.mrf.mxu0  ;;  %1162 = vmatmul.mubr.bf16.gmra.mxu1 %v510_v54 }
 0x104   : >> { %v1733_v41 = vadd.f32 %v1601_v34, %v463_v40  ;;  %v1915_v45 = vmax.f32 %v1727_v38, 0.0 }
 0x105   : >> { %v1139_v50 = vpop.f32.mrf.mxu0 }
 0x106   : >> { %v1913_v52 = vmax.f32 %v1733_v41, 0.0  ;;  %v512_v53 = vpack.c.bf16 %v1915_v45, %v1916_v49  ;;  %v1754_v37 = vadd.f32 %v1139_v50, %v1601_v34 }
 0x107   : >> { %v476_v58 = vpop.f32.mrf.mxu0 }
 0x108   : >> { %v511_v48 = vpack.c.bf16 %v1913_v52, %v1914_v47  ;;  %v1748_v40 = vadd.f32 %v1601_v34, %v476_v58  ;;  %v1920_v58 = vmax.f32 %v1754_v37, 0.0 }
 0x109   : >> { %v1140_v54 = vpop.f32.mrf.mxu0 }
 0x10a   : >> { %v1751_v51 = vadd.f32 %v1140_v54, %v1601_v34  ;;  %1165 = vmatprep.mubr.bf16.mxu1 %v511_v48  ;;  %v1918_v45 = vmax.f32 %v1748_v40, 0.0  ;;  %v1068_v54 = vcombine.low %v1521_v18, %v1526_v19 }
 0x10b   : >> { %v479_v63 = vpop.f32.mrf.mxu0  ;;  %1166 = vmatmul.mubr.bf16.gmra.mxu1 %v512_v53  ;;  %v1069_v53 = vcombine.low %v1531_v20, %v1536_v21 }
 0x10c   : >> { %v1757_v52 = vadd.f32 %v1601_v34, %v479_v63  ;;  %v1919_v47 = vmax.f32 %v1751_v51, 0.0  ;;  %v1070_v63 = vcombine.low %v1541_v22, %v1546_v23 }
 0x10e   : >> { %v1917_v49 = vmax.f32 %v1757_v52, 0.0  ;;  %v514_v50 = vpack.c.bf16 %v1919_v47, %v1920_v58  ;;  %1183 = vmatprep.subr.bf16.mxu0 %v1070_v63 }
 0x10f   : >> { %1184 = vmatpush3.bf16.msra.mxu0 %v1070_v63 }
 0x110   : >> { %v513_v48 = vpack.c.bf16 %v1917_v49, %v1918_v45  ;;  %1185 = vmatprep.subr.bf16.mxu0 %v1069_v53 }
 0x112   : >> { %1169 = vmatprep.mubr.bf16.mxu1 %v513_v48 }
 0x113   : >> { %1170 = vmatmul.mubr.bf16.gmra.mxu1 %v514_v50  ;;  %1186 = vmatpush3.bf16.msra.mxu0 %v1069_v53 }
 0x114   : >> { %1187 = vmatprep.subr.bf16.mxu0 %v1068_v54 }
 0x117   : >> { %1188 = vmatpush3.bf16.msra.mxu0 %v1068_v54 }
 0x1bb   : >> { %v1159_v49 = vpop.f32.mrf.mxu1 }
 0x1bc   : >> { %v612_v58 = vadd.f32 %v1159_v49, %v1606_v35 }
 0x1bd   : >> { %v603_v45 = vpop.f32.mrf.mxu1 }
 0x1be   : >> { %v604_v48 = vadd.f32 %v1606_v35, %v603_v45  ;;  %v668_v2 = vmax.f32 %v612_v58, 0.0 }
 0x1bf   : >> { %v1160_v47 = vpop.f32.mrf.mxu1 }
 0x1c0   : >> { %v615_v50 = vadd.f32 %v1160_v47, %v1606_v35  ;;  %v666_v53 = vmax.f32 %v604_v48, 0.0 }
 0x1c1   : >> { %v606_v63 = vpop.f32.mrf.mxu1 }
 0x1c2   : >> { %v607_v60 = vadd.f32 %v1606_v35, %v606_v63  ;;  %v669_v62 = vmax.f32 %v615_v50, 0.0 }
 0x1c3   : >> { %v1163_v0 = vpop.f32.mrf.mxu1 }
 0x1c4   : >> { %v667_v1 = vmax.f32 %v607_v60, 0.0  ;;  %v683_v54 = vpack.c.bf16 %v669_v62, %v668_v2  ;;  %v628_v47 = vadd.f32 %v1163_v0, %v1606_v35 }
 0x1c5   : >> { %v619_v3 = vpop.f32.mrf.mxu1 }
 0x1c6   : >> { %v682_v4 = vpack.c.bf16 %v667_v1, %v666_v53  ;;  %v620_v6 = vadd.f32 %v1606_v35, %v619_v3  ;;  %v672_v58 = vmax.f32 %v628_v47, 0.0 }
 0x1c7   : >> { %v1164_v5 = vpop.f32.mrf.mxu1 }
 0x1c8   : >> { %v631_v45 = vadd.f32 %v1164_v5, %v1606_v35  ;;  %1189 = vmatprep.mubr.bf16.mxu0 %v682_v4  ;;  %v670_v48 = vmax.f32 %v620_v6, 0.0 }
 0x1c9   : >> { %v622_v49 = vpop.f32.mrf.mxu1  ;;  %1190 = vmatmul.mubr.bf16.vlgmr.msra.gmra.mxu0 %v683_v54 }
 0x1ca   : >> { %v623_v63 = vadd.f32 %v1606_v35, %v622_v49  ;;  %v673_v50 = vmax.f32 %v631_v45, 0.0 }
 0x1cb   : >> { %v1167_v7 = vpop.f32.mrf.mxu1 }
 0x1cc   : >> { %v671_v60 = vmax.f32 %v623_v63, 0.0  ;;  %v685_v2 = vpack.c.bf16 %v673_v50, %v672_v58  ;;  %v644_v0 = vadd.f32 %v1167_v7, %v1606_v35 }
 0x1cd   : >> { %v635_v8 = vpop.f32.mrf.mxu1 }
 0x1ce   : >> { %v684_v1 = vpack.c.bf16 %v671_v60, %v670_v48  ;;  %v636_v3 = vadd.f32 %v1606_v35, %v635_v8  ;;  %v676_v47 = vmax.f32 %v644_v0, 0.0 }
 0x1cf   : >> { %v1168_v62 = vpop.f32.mrf.mxu1 }
 0x1d0   : >> { %v647_v5 = vadd.f32 %v1168_v62, %v1606_v35  ;;  %1193 = vmatprep.mubr.bf16.mxu0 %v684_v1  ;;  %v674_v6 = vmax.f32 %v636_v3, 0.0 }
 0x1d1   : >> { %v638_v4 = vpop.f32.mrf.mxu1  ;;  %1194 = vmatmul.mubr.bf16.gmra.mxu0 %v685_v2 }
 0x1d2   : >> { %v639_v53 = vadd.f32 %v1606_v35, %v638_v4  ;;  %v677_v54 = vmax.f32 %v647_v5, 0.0 }
 0x1d3   : >> { %v1171_v45 = vpop.f32.mrf.mxu1 }
 0x1d4   : >> { %v675_v49 = vmax.f32 %v639_v53, 0.0  ;;  %v687_v50 = vpack.c.bf16 %v677_v54, %v676_v47  ;;  %v660_v7 = vadd.f32 %v1171_v45, %v1606_v35 }
 0x1d5   : >> { %v651_v63 = vpop.f32.mrf.mxu1 }
 0x1d6   : >> { %v686_v48 = vpack.c.bf16 %v675_v49, %v674_v6  ;;  %v652_v8 = vadd.f32 %v1606_v35, %v651_v63  ;;  %v680_v4 = vmax.f32 %v660_v7, 0.0 }
 0x1d7   : >> { %v1172_v60 = vpop.f32.mrf.mxu1 }
 0x1d8   : >> { %v663_v58 = vadd.f32 %v1172_v60, %v1606_v35  ;;  %1197 = vmatprep.mubr.bf16.mxu0 %v686_v48  ;;  %v678_v5 = vmax.f32 %v652_v8, 0.0  ;;  %v1943_v60 = vmax.f32 %v1676_v55, 0.0 }
 0x1d9   : >> { %v654_v1 = vpop.f32.mrf.mxu1  ;;  %1198 = vmatmul.mubr.bf16.gmra.mxu0 %v687_v50 }
 0x1da   : >> { %v655_v2 = vadd.f32 %v1606_v35, %v654_v1  ;;  %v681_v62 = vmax.f32 %v663_v58, 0.0  ;;  %v1944_v58 = vmax.f32 %v1679_v56, 0.0  ;;  %v1947_v56 = vmax.f32 %v1706_v44, 0.0 }
 0x1dc   : >> { %v679_v3 = vmax.f32 %v655_v2, 0.0  ;;  %v689_v53 = vpack.c.bf16 %v681_v62, %v680_v4  ;;  %v1945_v2 = vmax.f32 %v1685_v59, 0.0 }
 0x1de   : >> { %v688_v0 = vpack.c.bf16 %v679_v3, %v678_v5  ;;  %v1946_v5 = vmax.f32 %v1682_v57, 0.0  ;;  %v1948_v57 = vmax.f32 %v1700_v42, 0.0 }
 0x1e0   : >> { %1201 = vmatprep.mubr.bf16.mxu0 %v688_v0 }
 0x1e1   : >> { %1202 = vmatmul.mubr.bf16.gmra.mxu0 %v689_v53 }
 0x289   : >> { %v1191_v54 = vpop.f32.mrf.mxu0 }
 0x28a   : >> { %v787_v45 = vadd.f32 %v1191_v54, %v1611_v36 }
 0x28b   : >> { %v778_v6 = vpop.f32.mrf.mxu0 }
 0x28c   : >> { %v779_v49 = vadd.f32 %v1611_v36, %v778_v6  ;;  %v843_v3 = vadd.f32 %v787_v45, %v1946_v5 }
 0x28d   : >> { %v1192_v47 = vpop.f32.mrf.mxu0 }
 0x28e   : >> { %v790_v63 = vadd.f32 %v1192_v47, %v1611_v36  ;;  %v841_v8 = vadd.f32 %v779_v49, %v1943_v60  ;;  %v859_v49 = vmax.f32 %v843_v3, 0.0 }
 0x28f   : >> { %v781_v48 = vpop.f32.mrf.mxu0 }
 0x290   : >> { %v782_v50 = vadd.f32 %v1611_v36, %v781_v48  ;;  %v844_v7 = vadd.f32 %v790_v63, %v1944_v58  ;;  %v857_v6 = vmax.f32 %v841_v8, 0.0 }
 0x291   : >> { %v1195_v1 = vpop.f32.mrf.mxu0 }
 0x292   : >> { %v842_v62 = vadd.f32 %v782_v50, %v1945_v2  ;;  %v803_v4 = vadd.f32 %v1195_v1, %v1611_v36  ;;  %v860_v47 = vmax.f32 %v844_v7, 0.0  ;;  %v1949_v1 = vmax.f32 %v1703_v43, 0.0 }
 0x293   : >> { %v794_v0 = vpop.f32.mrf.mxu0  ;;  %v1950_v7 = vmax.f32 %v1709_v46, 0.0 }
 0x294   : >> { %v858_v53 = vmax.f32 %v842_v62, 0.0  ;;  %v795_v54 = vadd.f32 %v1611_v36, %v794_v0  ;;  %v847_v63 = vadd.f32 %v803_v4, %v1947_v56  ;;  %v880_v58 = vmax.f32 %v859_v49, %v860_v47 }
 0x295   : >> { %v1196_v55 = vpop.f32.mrf.mxu0  ;;  %v1951_v56 = vmax.f32 %v1730_v39, 0.0 }
 0x296   : >> { %v873_v48 = vmax.f32 %v857_v6, %v858_v53  ;;  %v806_v59 = vadd.f32 %v1196_v55, %v1611_v36  ;;  %v845_v45 = vadd.f32 %v795_v54, %v1948_v57  ;;  %v863_v3 = vmax.f32 %v847_v63, 0.0 }
 0x297   : >> { %v797_v50 = vpop.f32.mrf.mxu0  ;;  %v881_v42 = vrot.slane %v880_v58, 4  ;;  %v1952_v57 = vmax.f32 %v1724_v61, 0.0 }
 0x298   : >> { %v798_v60 = vadd.f32 %v1611_v36, %v797_v50  ;;  %v848_v2 = vadd.f32 %v806_v59, %v1949_v1  ;;  %v874_v5 = vrot.slane %v873_v48, 4  ;;  %v861_v53 = vmax.f32 %v845_v45, 0.0 }
 0x299   : >> { %v1199_v8 = vpop.f32.mrf.mxu0  ;;  %v882_v1 = vmax.f32 %v880_v58, %v881_v42 }
 0x29a   : >> { %v846_v62 = vadd.f32 %v798_v60, %v1950_v7  ;;  %v864_v44 = vmax.f32 %v848_v2, 0.0  ;;  %v819_v4 = vadd.f32 %v1199_v8, %v1611_v36  ;;  %v875_v43 = vmax.f32 %v873_v48, %v874_v5 }
 0x29b   : >> { %v810_v0 = vpop.f32.mrf.mxu0  ;;  %v1953_v8 = vmax.f32 %v1727_v38, 0.0  ;;  %v1954_v48 = vmax.f32 %v1733_v41, 0.0 }
 0x29c   : >> { %v862_v6 = vmax.f32 %v846_v62, 0.0  ;;  %v894_v54 = vmax.f32 %v863_v3, %v864_v44  ;;  %v811_v55 = vadd.f32 %v1611_v36, %v810_v0  ;;  %v851_v59 = vadd.f32 %v819_v4, %v1951_v56 }
 0x29d   : >> { %v1200_v47 = vpop.f32.mrf.mxu0  ;;  %v876_v44 = vrot.slane %v875_v43, 2 }
 0x29e   : >> { %v887_v49 = vmax.f32 %v861_v53, %v862_v6  ;;  %v822_v46 = vadd.f32 %v1200_v47, %v1611_v36  ;;  %v849_v60 = vadd.f32 %v811_v55, %v1952_v57  ;;  %v895_v2 = vrot.slane %v894_v54, 4 }
 0x29f   : >> { %v813_v50 = vpop.f32.mrf.mxu0  ;;  %v867_v4 = vmax.f32 %v851_v59, 0.0  ;;  %v883_v47 = vrot.slane %v882_v1, 2 }
 0x2a0   : >> { %v888_v63 = vrot.slane %v887_v49, 4  ;;  %v814_v45 = vadd.f32 %v1611_v36, %v813_v50  ;;  %v852_v7 = vadd.f32 %v822_v46, %v1953_v8  ;;  %v865_v6 = vmax.f32 %v849_v60, 0.0 }
 0x2a1   : >> { %v1203_v62 = vpop.f32.mrf.mxu0  ;;  %v896_v58 = vmax.f32 %v894_v54, %v895_v2  ;;  %v1956_v60 = vmax.f32 %v1748_v40, 0.0  ;;  %v1957_v54 = vmax.f32 %v1751_v51, 0.0 }
 0x2a2   : >> { %v889_v3 = vmax.f32 %v887_v49, %v888_v63  ;;  %v850_v39 = vadd.f32 %v814_v45, %v1954_v48  ;;  %v835_v5 = vadd.f32 %v1203_v62, %v1611_v36  ;;  %v868_v0 = vmax.f32 %v852_v7, 0.0 }
 0x2a3   : >> { %v826_v53 = vpop.f32.mrf.mxu0  ;;  %v1955_v49 = vmax.f32 %v1754_v37, 0.0  ;;  %v877_v63 = vmax.f32 %v875_v43, %v876_v44  ;;  %v884_v48 = vmax.f32 %v882_v1, %v883_v47  ;;  %v1958_v43 = vmax.f32 %v1757_v52, 0.0 }
 0x2a4   : >> { %v890_v61 = vrot.slane %v889_v3, 2  ;;  %v866_v55 = vmax.f32 %v850_v39, 0.0  ;;  %v908_v42 = vmax.f32 %v867_v4, %v868_v0  ;;  %v827_v38 = vadd.f32 %v1611_v36, %v826_v53 }
 0x2a5   : >> { %v1204_v56 = vpop.f32.mrf.mxu0  ;;  %v855_v41 = vadd.f32 %v835_v5, %v1955_v49  ;;  %v897_v39 = vrot.slane %v896_v58, 2  ;;  %v878_v44 = vrot.slane %v877_v63, 1 }
 0x2a6   : >> { %v901_v46 = vmax.f32 %v865_v6, %v866_v55  ;;  %v838_v50 = vadd.f32 %v1204_v56, %v1611_v36  ;;  %v891_v57 = vmax.f32 %v889_v3, %v890_v61  ;;  %v909_v59 = vrot.slane %v908_v42, 4 }
 0x2a7   : >> { %v829_v45 = vpop.f32.mrf.mxu0  ;;  %v853_v7 = vadd.f32 %v827_v38, %v1956_v60  ;;  %v871_v5 = vmax.f32 %v855_v41, 0.0  ;;  %v885_v38 = vrot.slane %v884_v48, 1  ;;  %v898_v51 = vmax.f32 %v896_v58, %v897_v39 }
 0x2a8   : >> { %v902_v8 = vrot.slane %v901_v46, 4  ;;  %v856_v2 = vadd.f32 %v838_v50, %v1957_v54  ;;  %v830_v62 = vadd.f32 %v1611_v36, %v829_v45  ;;  %v910_v4 = vmax.f32 %v908_v42, %v909_v59 }
 0x2a9   : >> { %v892_v53 = vrot.slane %v891_v57, 1  ;;  %v869_v6 = vmax.f32 %v853_v7, 0.0  ;;  %v879_v47 = vmax.f32 %v877_v63, %v878_v44  ;;  %v886_v52 = vmax.f32 %v884_v48, %v885_v38 }
 0x2aa   : >> { %v903_v37 = vmax.f32 %v901_v46, %v902_v8  ;;  %v872_v0 = vmax.f32 %v856_v2, 0.0  ;;  %v854_v3 = vadd.f32 %v830_v62, %v1958_v43  ;;  %v911_v56 = vrot.slane %v910_v4, 2 }
 0x2ab   : >> { %v893_v42 = vmax.f32 %v891_v57, %v892_v53  ;;  %v899_v45 = vrot.slane %v898_v51, 1  ;;  %v938_v54 = vsel %vm937_vm3, %v886_v52, %v879_v47 }
 0x2ac   : >> { %v904_v61 = vrot.slane %v903_v37, 2  ;;  %v922_v40 = vmax.f32 %v871_v5, %v872_v0  ;;  %v870_v55 = vmax.f32 %v854_v3, 0.0  ;;  %v912_v8 = vmax.f32 %v910_v4, %v911_v56 }
 0x2ad   : >> { %v940_v58 = vsel %vm939_vm4, %v893_v42, %v938_v54 }
 0x2ae   : >> { %v905_v49 = vmax.f32 %v903_v37, %v904_v61  ;;  %v923_v50 = vrot.slane %v922_v40, 4  ;;  %v915_v1 = vmax.f32 %v869_v6, %v870_v55  ;;  %v900_v37 = vmax.f32 %v898_v51, %v899_v45 }
 0x2af   : >> { %v913_v63 = vrot.slane %v912_v8, 1 }
 0x2b0   : >> { %v906_v46 = vrot.slane %v905_v49, 1  ;;  %v924_v41 = vmax.f32 %v922_v40, %v923_v50  ;;  %v916_v59 = vrot.slane %v915_v1, 4  ;;  %v942_v5 = vsel %vm941_vm5, %v900_v37, %v940_v58 }
 0x2b1   : >> { %v914_v4 = vmax.f32 %v912_v8, %v913_v63 }
 0x2b2   : >> { %v925_v60 = vrot.slane %v924_v41, 2  ;;  %v917_v7 = vmax.f32 %v915_v1, %v916_v59  ;;  %v907_v2 = vmax.f32 %v905_v49, %v906_v46 }
 0x2b4   : >> { %v926_v62 = vmax.f32 %v924_v41, %v925_v60  ;;  %v918_v39 = vrot.slane %v917_v7, 2  ;;  %v944_v48 = vsel %vm943_vm6, %v907_v2, %v942_v5 }
 0x2b5   : >> { %v946_v53 = vsel %vm945_vm7, %v914_v4, %v944_v48 }
 0x2b6   : >> { %v919_v57 = vmax.f32 %v917_v7, %v918_v39  ;;  %v927_v0 = vrot.slane %v926_v62, 1 }
 0x2b8   : >> { %v920_v43 = vrot.slane %v919_v57, 1  ;;  %v928_v44 = vmax.f32 %v926_v62, %v927_v0 }
 0x2ba   : >> { %v921_v3 = vmax.f32 %v919_v57, %v920_v43  ;;  %322 = sbr.rel (!%p320_p11) target bundleno = 36 (0x24), region = 92 }
 0x2bc   : >> { %v948_v61 = vsel %vm947_vm8, %v921_v3, %v946_v53 }
 0x2bd   : >> { %v950_v6 = vsel %vm949_vm9, %v928_v44, %v948_v61 }
 0x2be   : >> { %953 = vst [vmem:[%s952_s21] sm:$0xff] %v950_v6 }
 0x2bf   : > { %1268 = shalt.err (!%p1265_p4)
}
 0x2c0   : > { %s1269_s13 = scalar_lea.hbm %s1851_s14, 256  ;;  %s1273_s15 = scalar_lea.hbm %s1906_s7, 512 }
 0x2c1   : > { %p1270_p7 = scmp.ne.s32.totalorder %s1851_s14, %s1269_s13  ;;  %p1274_p10 = scmp.lt.s32.totalorder %s1851_s14, %s1906_s7 }
 0x2c2   : > { %p1275_p11 = scmp.lt.s32.totalorder %s1273_s15, %s1269_s13 }
 0x2c3   : > { %p1271_p8 = pnand %p1270_p7, %p1407_p5 }
 0x2c4   : > { %p1276_p12 = por %p1275_p11, %p1274_p10 }
 0x2c5   : > { %p1272_p9 = pneg %p1271_p8 }
 0x2c7   : > { %p1277_p13 = pnand %p1276_p12, %p1272_p9 }
 0x2c9   : > { %1280 = shalt.err (!%p1277_p13)
}
 0x2ca   : > { %s1327_s29 = smov 128   ;;  %s1328_s8 = smov 8  }
 0x2cb   : > { %1205 = dma.vmem_to_hbm [thread:$0]  (%p1407_p5), %s1855_s9, 256, %s1851_s14, %s1859_s17, %s1327_s29, %s1327_s29, %s1328_s8  }
 0x2cc PF: > { %p1211_p0 = scmp.ge.s32.totalorder %s1319_s27, 2  ;;  %s983_s23 = sand.u32 1, %s1307_s24  }
 0x2cd   : > { %s984_s28 = scalar_lea.sflag [#allocation3], %s983_s23 }
 0x2ce   : > { %p1208_p1 = pnand %p1211_p0, %p1411_p6 }
 0x2d0   : > { %p1209_p2 = pneg %p1208_p1 }
 0x2d2   : > { %1302 = dma.done.wait (%p1209_p2), %s984_s28, 256  }
 0x2d3   : > { %1304 = vsyncadd (%p1209_p2), %s984_s28, 4294967040  ;;  %p17_p3 = scmp.ge.s32.totalorder %s1394_s30, 4   ;;  %s1959_s24 = smov %s1311_s25 }
 0x2d4   : > { %s1960_s25 = smov %s1315_s26  ;;  %s1961_s26 = smov %s1405_s10 }
 0x2d5   : > { %s1962_s27 = smov %s1394_s30  ;;  %19 = sbr.rel (!%p17_p3) target bundleno = 3 (0x3), region = 103 }
 0x2da   :  { %989 = vsyncpa [#allocation3], 1 }
 0x2db   :  { %991 = vsyncpa [#allocation3 + $0x1], 1 }

</bundles_post_ra>
